<compile_context>
chip_gen: v7x
topology: tpu7x:2x2x1
jax: 0.10.0
libtpu: 0.0.40
codegen_flags: <defaults>
</compile_context>

<pallas_src>
import random

import jax
import jax.numpy as jnp
from jax import lax
from jax.experimental import pallas as pl
from jax.experimental.pallas import tpu as pltpu

_SUBLANE = 8     # batch padded to a sublane multiple
_LANE = 128      # feature dims padded to a lane multiple


def _ceil_to(x, m):
    return ((x + m - 1) // m) * m


# ----------------------------- Pallas kernels ------------------------------

def _lstm_step(x, h, c, w, b):
    """One LSTM cell step with fused [x;h] @ [W_ih;W_hh] matmul.

    x: (B, Ep), h/c: (B, Hp), w: (Ep+Hp, 4*Hp), b: (1, 4*Hp).
    Gate slices are lane-aligned because Hp is a multiple of 128.
    """
    Hp = h.shape[-1]
    xh = jnp.concatenate([x, h], axis=-1)
    gates = jnp.dot(xh, w, preferred_element_type=jnp.float32) + b
    i = jax.nn.sigmoid(gates[:, 0 * Hp:1 * Hp])
    f = jax.nn.sigmoid(gates[:, 1 * Hp:2 * Hp])
    g = jnp.tanh(gates[:, 2 * Hp:3 * Hp])
    o = jax.nn.sigmoid(gates[:, 3 * Hp:4 * Hp])
    c_new = f * c + i * g
    h_new = o * jnp.tanh(c_new)
    return h_new, c_new


def encoder_kernel(xemb_ref, w_ref, b_ref, h_ref, c_ref):
    """grid=(T_src,): one encoder time step per grid point.  The h/c outputs
    double as the recurrent state (constant output index map -> VMEM-resident
    across the whole grid, written back to HBM once)."""
    t = pl.program_id(0)

    @pl.when(t == 0)
    def _():
        h_ref[...] = jnp.zeros_like(h_ref)
        c_ref[...] = jnp.zeros_like(c_ref)

    h_new, c_new = _lstm_step(xemb_ref[...], h_ref[...], c_ref[...],
                              w_ref[...], b_ref[...])
    h_ref[...] = h_new
    c_ref[...] = c_new


def decoder_kernel(tf_ref,                                   # scalar prefetch
                   tgt_emb_ref, h0_ref, c0_ref, emb_ref,
                   w_ref, b_ref, wfc_ref, bfc_ref,
                   logits_ref,
                   h_sc, c_sc, pemb_sc):
    """Whole teacher-forcing decode loop fused into one pallas_call."""
    s = pl.program_id(0)

    @pl.when(s == 0)
    def _():
        h_sc[...] = h0_ref[...]
        c_sc[...] = c0_ref[...]
        pemb_sc[...] = jnp.zeros_like(pemb_sc)

    # Select this step's input embedding: teacher token vs previous greedy
    # prediction (scalar blend; tf is 0/1).
    tf = (tf_ref[s] > 0).astype(jnp.float32)
    x = tgt_emb_ref[...] * tf + pemb_sc[...] * (1.0 - tf)

    h_new, c_new = _lstm_step(x, h_sc[...], c_sc[...], w_ref[...], b_ref[...])
    logits = (jnp.dot(h_new, wfc_ref[...], preferred_element_type=jnp.float32)
              + bfc_ref[...])
    logits_ref[...] = logits
    h_sc[...] = h_new
    c_sc[...] = c_new

    # Greedy argmax (first max wins) -> one-hot -> embedding lookup as an MXU
    # matmul; stored for the next (non-teacher-forced) step.
    col = lax.broadcasted_iota(jnp.int32, logits.shape, 1)
    maxv = jnp.max(logits, axis=-1, keepdims=True)
    idx = jnp.min(jnp.where(logits == maxv, col, logits.shape[-1]),
                  axis=-1, keepdims=True)
    onehot = (col == idx).astype(jnp.float32)
    pemb_sc[...] = jnp.dot(onehot, emb_ref[...],
                           preferred_element_type=jnp.float32)


# ------------------------------ Wrappers -----------------------------------

def run_encoder(src_emb_tbe, w, b):
    """src_emb_tbe: (T, Bp, Ep) f32 -> (h (Bp,Hp), c (Bp,Hp))."""
    T, Bp, Ep = src_emb_tbe.shape
    Hp = w.shape[1] // 4
    return pl.pallas_call(
        encoder_kernel,
        out_shape=(jax.ShapeDtypeStruct((Bp, Hp), jnp.float32),
                   jax.ShapeDtypeStruct((Bp, Hp), jnp.float32)),
        grid_spec=pltpu.PrefetchScalarGridSpec(
            num_scalar_prefetch=0,
            grid=(T,),
            in_specs=[pl.BlockSpec((None, Bp, Ep), lambda t: (t, 0, 0)),
                      pl.BlockSpec(w.shape, lambda t: (0, 0)),
                      pl.BlockSpec(b.shape, lambda t: (0, 0))],
            out_specs=(pl.BlockSpec((Bp, Hp), lambda t: (0, 0)),
                       pl.BlockSpec((Bp, Hp), lambda t: (0, 0)))),
        compiler_params=pltpu.CompilerParams(
            dimension_semantics=("arbitrary",)),
    )(src_emb_tbe, w, b)


def run_decoder(tf_flags, tgt_emb_tbe, h0, c0, emb_p, w, b, wfc, bfc):
    """Fused decoder loop.  Returns logits slab (T_dec, Bp, Vp)."""
    T, Bp, Ep = tgt_emb_tbe.shape
    Hp = h0.shape[1]
    Vp = wfc.shape[1]

    def const_spec(arr):
        n = arr.ndim
        return pl.BlockSpec(arr.shape, lambda s, tf, _n=n: (0,) * _n)

    return pl.pallas_call(
        decoder_kernel,
        out_shape=jax.ShapeDtypeStruct((T, Bp, Vp), jnp.float32),
        grid_spec=pltpu.PrefetchScalarGridSpec(
            num_scalar_prefetch=1,
            grid=(T,),
            in_specs=[pl.BlockSpec((None, Bp, Ep), lambda s, tf: (s, 0, 0)),
                      const_spec(h0), const_spec(c0),
                      const_spec(emb_p),
                      const_spec(w), const_spec(b),
                      const_spec(wfc), const_spec(bfc)],
            out_specs=pl.BlockSpec((None, Bp, Vp), lambda s, tf: (s, 0, 0)),
            scratch_shapes=[pltpu.VMEM((Bp, Hp), jnp.float32),
                            pltpu.VMEM((Bp, Hp), jnp.float32),
                            pltpu.VMEM((Bp, Ep), jnp.float32)]),
        compiler_params=pltpu.CompilerParams(
            dimension_semantics=("arbitrary",)),
    )(tf_flags, tgt_emb_tbe, h0, c0, emb_p, w, b, wfc, bfc)


# ----------------------- parameter padding / fusion -------------------------

def _pad_gate_cols(w, H, Hp):
    """(rows, 4H) -> (rows, 4Hp) keeping each gate block lane-aligned."""
    rows = w.shape[0]
    out = jnp.zeros((rows, 4 * Hp), w.dtype)
    for k in range(4):
        out = out.at[:, k * Hp:k * Hp + H].set(w[:, k * H:(k + 1) * H])
    return out


def pack_params(params):
    """Pad + fuse the logical parameters into the kernel-ready layout."""
    E = params["enc_wih"].shape[0]
    H = params["enc_whh"].shape[0]
    V = params["dec_fc_w"].shape[1]
    Ep, Hp, Vp = _ceil_to(E, _LANE), _ceil_to(H, _LANE), _ceil_to(V, _LANE)

    def fuse_lstm(wih, whh, b):
        wih_p = jnp.zeros((Ep, 4 * Hp), jnp.float32).at[:E].set(
            _pad_gate_cols(wih, H, Hp))
        whh_p = jnp.zeros((Hp, 4 * Hp), jnp.float32).at[:H].set(
            _pad_gate_cols(whh, H, Hp))
        return (jnp.concatenate([wih_p, whh_p], axis=0),
                _pad_gate_cols(b, H, Hp))

    enc_w, enc_b = fuse_lstm(params["enc_wih"], params["enc_whh"],
                             params["enc_b"])
    dec_w, dec_b = fuse_lstm(params["dec_wih"], params["dec_whh"],
                             params["dec_b"])

    wfc = jnp.zeros((Hp, Vp), jnp.float32).at[:H, :V].set(params["dec_fc_w"])
    # Padded vocab columns get a huge negative bias so they never win argmax.
    bfc = jnp.full((1, Vp), -1e30, jnp.float32).at[:, :V].set(
        params["dec_fc_b"])
    dec_emb_p = jnp.zeros((Vp, Ep), jnp.float32).at[
        :params["dec_emb"].shape[0], :E].set(params["dec_emb"])

    return dict(enc_w=enc_w, enc_b=enc_b, dec_w=dec_w, dec_b=dec_b,
                wfc=wfc, bfc=bfc, dec_emb_p=dec_emb_p)


# ------------------------------ Forward pass --------------------------------

def _forward_impl(params, source, target, tf_flags):
    B, src_len = source.shape
    target_len = target.shape[1]
    E = params["enc_wih"].shape[0]
    H = params["enc_whh"].shape[0]
    V = params["dec_fc_w"].shape[1]
    Ep, Hp, Vp = _ceil_to(E, _LANE), _ceil_to(H, _LANE), _ceil_to(V, _LANE)
    Bp = _ceil_to(B, _SUBLANE)

    packed = pack_params(params)

    # --- encoder ---
    src_emb = jnp.take(params["enc_emb"], source, axis=0)          # (B,Ts,E)
    src_emb = jnp.transpose(src_emb, (1, 0, 2))                    # (Ts,B,E)
    src_emb = jnp.zeros((src_len, Bp, Ep), jnp.float32).at[
        :, :B, :E].set(src_emb)
    h0, c0 = run_encoder(src_emb, packed["enc_w"], packed["enc_b"])

    # --- decoder (fused teacher-forcing loop) ---
    T_dec = target_len - 1
    teach_tok = target[:, :T_dec]                                  # (B,T_dec)
    tgt_emb = jnp.take(params["dec_emb"], teach_tok, axis=0)       # (B,T_dec,E)
    tgt_emb = jnp.transpose(tgt_emb, (1, 0, 2))                    # (T_dec,B,E)
    tgt_emb = jnp.zeros((T_dec, Bp, Ep), jnp.float32).at[
        :, :B, :E].set(tgt_emb)

    logits_pad = run_decoder(tf_flags, tgt_emb, h0, c0,
                             packed["dec_emb_p"], packed["dec_w"],
                             packed["dec_b"], packed["wfc"], packed["bfc"])
    logits = jnp.transpose(logits_pad, (1, 0, 2))[:B, :, :V]       # (B,T-1,V)
    # outputs[:, 0] stays zero, as in the reference module.
    return jnp.concatenate(
        [jnp.zeros((B, 1, V), jnp.float32), logits], axis=1)


_forward_jit = jax.jit(_forward_impl)


def seq2seq_forward(params, source, target, teacher_forcing_ratio=0.5,
                    tf_seed=0):
    """Mirrors Seq2Seq.forward: outputs (B, target_len, V)."""
    target_len = int(target.shape[1])
    # TODO(synk): torch's random.random() teacher forcing is reproduced with a
    # fixed-seed Python RNG rather than matching torch's global RNG stream.
    rng = random.Random(tf_seed)
    # Step 0 always consumes target[:, 0]; the decision drawn at original loop
    # iteration t gates the input of iteration t+1 (kernel step t).
    flags = [1] + [int(rng.random() < teacher_forcing_ratio)
                   for _ in range(1, target_len - 1)]
    tf_flags = jnp.asarray(flags, dtype=jnp.int32)
    return _forward_jit(params, source, target, tf_flags)


# ------------------------------ Parameters ---------------------------------

def init_params(key, src_vocab, tgt_vocab, emb, hidden):
    ks = jax.random.split(key, 10)
    u = lambda k, s: jax.random.uniform(k, s, jnp.float32, -0.1, 0.1)
    return {
        # encoder: Embedding + single-layer LSTM  (weights stored transposed)
        "enc_emb": u(ks[0], (src_vocab, emb)),
        "enc_wih": u(ks[1], (emb, 4 * hidden)),
        "enc_whh": u(ks[2], (hidden, 4 * hidden)),
        "enc_b":   u(ks[3], (1, 4 * hidden)),      # b_ih + b_hh combined
        # decoder: Embedding + LSTM cell + Linear(hidden -> output_size)
        "dec_emb": u(ks[4], (tgt_vocab, emb)),
        "dec_wih": u(ks[5], (emb, 4 * hidden)),
        "dec_whh": u(ks[6], (hidden, 4 * hidden)),
        "dec_b":   u(ks[7], (1, 4 * hidden)),
        "dec_fc_w": u(ks[8], (hidden, tgt_vocab)),
        "dec_fc_b": u(ks[9], (1, tgt_vocab)),
    }


# --------------------------------- Main -------------------------------------

if __name__ == "__main__":
    B, SRC_LEN, TGT_LEN = 2, 8, 8
    SRC_VOCAB, TGT_VOCAB = 20, 32       # TGT_VOCAB == decoder.output_size
    EMB, HIDDEN = 16, 32

    key = jax.random.PRNGKey(0)
    k_par, k_src, k_tgt = jax.random.split(key, 3)
    params = init_params(k_par, SRC_VOCAB, TGT_VOCAB, EMB, HIDDEN)

    source = jax.random.randint(k_src, (B, SRC_LEN), 0, SRC_VOCAB, jnp.int32)
    target = jax.random.randint(k_tgt, (B, TGT_LEN), 0, TGT_VOCAB, jnp.int32)

    outputs = seq2seq_forward(params, source, target, teacher_forcing_ratio=0.5)
    outputs = jax.block_until_ready(outputs)

    assert outputs.shape == (B, TGT_LEN, TGT_VOCAB)
    assert outputs.dtype == jnp.float32
    assert bool(jnp.all(outputs[:, 0] == 0.0))
    print("KERNEL_OK")
</pallas_src>

<mosaic_0001>
module attributes {stable_mosaic.version = 11 : i64} {
  func.func @encoder_kernel(%arg0: i32, %arg1: memref<1x8x128xf32, #tpu.memory_space<vmem>>, %arg2: memref<256x512xf32, #tpu.memory_space<vmem>>, %arg3: memref<1x512xf32, #tpu.memory_space<vmem>>, %arg4: memref<8x128xf32, #tpu.memory_space<vmem>>, %arg5: memref<8x128xf32, #tpu.memory_space<vmem>>) attributes {dimension_semantics = [#tpu.dimension_semantics<arbitrary>], iteration_bounds = array<i64: 8>, scalar_prefetch = 0 : i64, scratch_operands = 0 : i64, tpu.core_type = #tpu.core_type<tc>, window_params = [{transform_indices = @transform_0, window_bounds = array<i64: 1, 8, 128>}, {pipeline_mode = #tpu.pipeline_mode<synchronous>, transform_indices = @transform_1, window_bounds = array<i64: 256, 512>}, {pipeline_mode = #tpu.pipeline_mode<synchronous>, transform_indices = @transform_2, window_bounds = array<i64: 1, 512>}, {pipeline_mode = #tpu.pipeline_mode<synchronous>, transform_indices = @transform_3, window_bounds = array<i64: 8, 128>}, {pipeline_mode = #tpu.pipeline_mode<synchronous>, transform_indices = @transform_4, window_bounds = array<i64: 8, 128>}]} {
    %c0_i32 = arith.constant 0 : i32
    %0 = arith.cmpi eq, %arg0, %c0_i32 : i32
    %1 = arith.extui %0 : i1 to i32
    %c0_i32_0 = arith.constant 0 : i32
    %2 = arith.cmpi ne, %1, %c0_i32_0 : i32
    scf.if %2 {
      %cst_18 = arith.constant 0.000000e+00 : f32
      %40 = vector.broadcast %cst_18 : f32 to vector<8x128xf32>
      %c0_19 = arith.constant 0 : index
      %c0_20 = arith.constant 0 : index
      %41 = vector.load %arg4[%c0_19, %c0_20] : memref<8x128xf32, #tpu.memory_space<vmem>>, vector<8x128xf32>
      tpu.vector_store %arg4[%c0_19, %c0_20], %40 {strides = array<i32>} : memref<8x128xf32, #tpu.memory_space<vmem>>, vector<8x128xf32>,
      %cst_21 = arith.constant 0.000000e+00 : f32
      %42 = vector.broadcast %cst_21 : f32 to vector<8x128xf32>
      %c0_22 = arith.constant 0 : index
      %c0_23 = arith.constant 0 : index
      %43 = vector.load %arg5[%c0_22, %c0_23] : memref<8x128xf32, #tpu.memory_space<vmem>>, vector<8x128xf32>
      tpu.vector_store %arg5[%c0_22, %c0_23], %42 {strides = array<i32>} : memref<8x128xf32, #tpu.memory_space<vmem>>, vector<8x128xf32>,
    } else {
    }
    %c0 = arith.constant 0 : index
    %c0_1 = arith.constant 0 : index
    %c0_2 = arith.constant 0 : index
    %3 = vector.load %arg1[%c0, %c0_1, %c0_2] : memref<1x8x128xf32, #tpu.memory_space<vmem>>, vector<1x8x128xf32>
    %4 = vector.shape_cast %3 : vector<1x8x128xf32> to vector<8x128xf32>
    %c0_3 = arith.constant 0 : index
    %c0_4 = arith.constant 0 : index
    %5 = vector.load %arg4[%c0_3, %c0_4] : memref<8x128xf32, #tpu.memory_space<vmem>>, vector<8x128xf32>
    %c0_5 = arith.constant 0 : index
    %c0_6 = arith.constant 0 : index
    %6 = vector.load %arg5[%c0_5, %c0_6] : memref<8x128xf32, #tpu.memory_space<vmem>>, vector<8x128xf32>
    %c0_7 = arith.constant 0 : index
    %c0_8 = arith.constant 0 : index
    %7 = vector.load %arg2[%c0_7, %c0_8] : memref<256x512xf32, #tpu.memory_space<vmem>>, vector<256x512xf32>
    %c0_9 = arith.constant 0 : index
    %c0_10 = arith.constant 0 : index
    %8 = vector.load %arg3[%c0_9, %c0_10] : memref<1x512xf32, #tpu.memory_space<vmem>>, vector<1x512xf32>
    %9 = tpu.concatenate %4, %5 in 1 : vector<8x128xf32>, vector<8x128xf32> -> vector<8x256xf32>
    %cst = arith.constant dense<0.000000e+00> : vector<8x512xf32>
    %10 = tpu.matmul %9, %7, %cst {dimension_numbers = #tpu.dot_dimension_numbers<[1], [0], [0], [1], [0, 0, 1, 1], [], []>} : vector<8x256xf32>, vector<256x512xf32>, vector<8x512xf32> -> vector<8x512xf32>
    %11 = vector.broadcast %8 : vector<1x512xf32> to vector<8x512xf32>
    %12 = arith.addf %10, %11 : vector<8x512xf32>
    %13 = vector.extract_strided_slice %12 {offsets = [0, 0], sizes = [8, 128], strides = [1, 1]} : vector<8x512xf32> to vector<8x128xf32>
    %14 = arith.negf %13 : vector<8x128xf32>
    %15 = math.exp %14 : vector<8x128xf32>
    %cst_11 = arith.constant 1.000000e+00 : f32
    %16 = vector.broadcast %cst_11 : f32 to vector<8x128xf32>
    %17 = arith.addf %16, %15 : vector<8x128xf32>
    %18 = arith.divf %16, %17 : vector<8x128xf32>
    %19 = vector.extract_strided_slice %12 {offsets = [0, 128], sizes = [8, 128], strides = [1, 1]} : vector<8x512xf32> to vector<8x128xf32>
    %20 = arith.negf %19 : vector<8x128xf32>
    %21 = math.exp %20 : vector<8x128xf32>
    %cst_12 = arith.constant 1.000000e+00 : f32
    %22 = vector.broadcast %cst_12 : f32 to vector<8x128xf32>
    %23 = arith.addf %22, %21 : vector<8x128xf32>
    %24 = arith.divf %22, %23 : vector<8x128xf32>
    %25 = vector.extract_strided_slice %12 {offsets = [0, 256], sizes = [8, 128], strides = [1, 1]} : vector<8x512xf32> to vector<8x128xf32>
    %26 = math.tanh %25 : vector<8x128xf32>
    %27 = vector.extract_strided_slice %12 {offsets = [0, 384], sizes = [8, 128], strides = [1, 1]} : vector<8x512xf32> to vector<8x128xf32>
    %28 = arith.negf %27 : vector<8x128xf32>
    %29 = math.exp %28 : vector<8x128xf32>
    %cst_13 = arith.constant 1.000000e+00 : f32
    %30 = vector.broadcast %cst_13 : f32 to vector<8x128xf32>
    %31 = arith.addf %30, %29 : vector<8x128xf32>
    %32 = arith.divf %30, %31 : vector<8x128xf32>
    %33 = arith.mulf %24, %6 : vector<8x128xf32>
    %34 = arith.mulf %18, %26 : vector<8x128xf32>
    %35 = arith.addf %33, %34 : vector<8x128xf32>
    %36 = math.tanh %35 : vector<8x128xf32>
    %37 = arith.mulf %32, %36 : vector<8x128xf32>
    %c0_14 = arith.constant 0 : index
    %c0_15 = arith.constant 0 : index
    %38 = vector.load %arg4[%c0_14, %c0_15] : memref<8x128xf32, #tpu.memory_space<vmem>>, vector<8x128xf32>
    tpu.vector_store %arg4[%c0_14, %c0_15], %37 {strides = array<i32>} : memref<8x128xf32, #tpu.memory_space<vmem>>, vector<8x128xf32>,
    %c0_16 = arith.constant 0 : index
    %c0_17 = arith.constant 0 : index
    %39 = vector.load %arg5[%c0_16, %c0_17] : memref<8x128xf32, #tpu.memory_space<vmem>>, vector<8x128xf32>
    tpu.vector_store %arg5[%c0_16, %c0_17], %35 {strides = array<i32>} : memref<8x128xf32, #tpu.memory_space<vmem>>, vector<8x128xf32>,
    return
  }
  func.func @transform_0(%arg0: i32) -> (i32, i32, i32) {
    %c0_i32 = arith.constant 0 : i32
    %c0_i32_0 = arith.constant 0 : i32
    %c0_i32_1 = arith.constant 0 : i32
    return %arg0, %c0_i32, %c0_i32_0 : i32, i32, i32
  }
  func.func @transform_1(%arg0: i32) -> (i32, i32) {
    %c0_i32 = arith.constant 0 : i32
    %c0_i32_0 = arith.constant 0 : i32
    %c0_i32_1 = arith.constant 0 : i32
    return %c0_i32, %c0_i32_0 : i32, i32
  }
  func.func @transform_2(%arg0: i32) -> (i32, i32) {
    %c0_i32 = arith.constant 0 : i32
    %c0_i32_0 = arith.constant 0 : i32
    %c0_i32_1 = arith.constant 0 : i32
    return %c0_i32, %c0_i32_0 : i32, i32
  }
  func.func @transform_3(%arg0: i32) -> (i32, i32) {
    %c0_i32 = arith.constant 0 : i32
    %c0_i32_0 = arith.constant 0 : i32
    %c0_i32_1 = arith.constant 0 : i32
    return %c0_i32, %c0_i32_0 : i32, i32
  }
  func.func @transform_4(%arg0: i32) -> (i32, i32) {
    %c0_i32 = arith.constant 0 : i32
    %c0_i32_0 = arith.constant 0 : i32
    %c0_i32_1 = arith.constant 0 : i32
    return %c0_i32, %c0_i32_0 : i32, i32
  }
}

module attributes {stable_mosaic.version = 11 : i64} {
  func.func @decoder_kernel(%arg0: i32, %arg1: memref<7xi32, #tpu.memory_space<smem>>, %arg2: memref<1x8x128xf32, #tpu.memory_space<vmem>>, %arg3: memref<8x128xf32, #tpu.memory_space<vmem>>, %arg4: memref<8x128xf32, #tpu.memory_space<vmem>>, %arg5: memref<128x128xf32, #tpu.memory_space<vmem>>, %arg6: memref<256x512xf32, #tpu.memory_space<vmem>>, %arg7: memref<1x512xf32, #tpu.memory_space<vmem>>, %arg8: memref<128x128xf32, #tpu.memory_space<vmem>>, %arg9: memref<1x128xf32, #tpu.memory_space<vmem>>, %arg10: memref<1x8x128xf32, #tpu.memory_space<vmem>>, %arg11: memref<8x128xf32, #tpu.memory_space<vmem>>, %arg12: memref<8x128xf32, #tpu.memory_space<vmem>>, %arg13: memref<8x128xf32, #tpu.memory_space<vmem>>) attributes {dimension_semantics = [#tpu.dimension_semantics<arbitrary>], iteration_bounds = array<i64: 7>, scalar_prefetch = 1 : i64, scratch_operands = 3 : i64, tpu.core_type = #tpu.core_type<tc>, window_params = [{transform_indices = @transform_0, window_bounds = array<i64: 1, 8, 128>}, {pipeline_mode = #tpu.pipeline_mode<synchronous>, transform_indices = @transform_1, window_bounds = array<i64: 8, 128>}, {pipeline_mode = #tpu.pipeline_mode<synchronous>, transform_indices = @transform_2, window_bounds = array<i64: 8, 128>}, {pipeline_mode = #tpu.pipeline_mode<synchronous>, transform_indices = @transform_3, window_bounds = array<i64: 128, 128>}, {pipeline_mode = #tpu.pipeline_mode<synchronous>, transform_indices = @transform_4, window_bounds = array<i64: 256, 512>}, {pipeline_mode = #tpu.pipeline_mode<synchronous>, transform_indices = @transform_5, window_bounds = array<i64: 1, 512>}, {pipeline_mode = #tpu.pipeline_mode<synchronous>, transform_indices = @transform_6, window_bounds = array<i64: 128, 128>}, {pipeline_mode = #tpu.pipeline_mode<synchronous>, transform_indices = @transform_7, window_bounds = array<i64: 1, 128>}, {transform_indices = @transform_8, window_bounds = array<i64: 1, 8, 128>}]} {
    %c0_i32 = arith.constant 0 : i32
    %0 = arith.cmpi eq, %arg0, %c0_i32 : i32
    %1 = arith.extui %0 : i1 to i32
    %c0_i32_0 = arith.constant 0 : i32
    %2 = arith.cmpi ne, %1, %c0_i32_0 : i32
    scf.if %2 {
      %c0_37 = arith.constant 0 : index
      %c0_38 = arith.constant 0 : index
      %76 = vector.load %arg3[%c0_37, %c0_38] : memref<8x128xf32, #tpu.memory_space<vmem>>, vector<8x128xf32>
      %c0_39 = arith.constant 0 : index
      %c0_40 = arith.constant 0 : index
      %77 = vector.load %arg11[%c0_39, %c0_40] : memref<8x128xf32, #tpu.memory_space<vmem>>, vector<8x128xf32>
      tpu.vector_store %arg11[%c0_39, %c0_40], %76 {strides = array<i32>} : memref<8x128xf32, #tpu.memory_space<vmem>>, vector<8x128xf32>,
      %c0_41 = arith.constant 0 : index
      %c0_42 = arith.constant 0 : index
      %78 = vector.load %arg4[%c0_41, %c0_42] : memref<8x128xf32, #tpu.memory_space<vmem>>, vector<8x128xf32>
      %c0_43 = arith.constant 0 : index
      %c0_44 = arith.constant 0 : index
      %79 = vector.load %arg12[%c0_43, %c0_44] : memref<8x128xf32, #tpu.memory_space<vmem>>, vector<8x128xf32>
      tpu.vector_store %arg12[%c0_43, %c0_44], %78 {strides = array<i32>} : memref<8x128xf32, #tpu.memory_space<vmem>>, vector<8x128xf32>,
      %cst_45 = arith.constant 0.000000e+00 : f32
      %80 = vector.broadcast %cst_45 : f32 to vector<8x128xf32>
      %c0_46 = arith.constant 0 : index
      %c0_47 = arith.constant 0 : index
      %81 = vector.load %arg13[%c0_46, %c0_47] : memref<8x128xf32, #tpu.memory_space<vmem>>, vector<8x128xf32>
      tpu.vector_store %arg13[%c0_46, %c0_47], %80 {strides = array<i32>} : memref<8x128xf32, #tpu.memory_space<vmem>>, vector<8x128xf32>,
    } else {
    }
    %3 = arith.index_cast %arg0 : i32 to index
    %4 = memref.load %arg1[%3] : memref<7xi32, #tpu.memory_space<smem>>
    %c0_i32_1 = arith.constant 0 : i32
    %5 = arith.cmpi sgt, %4, %c0_i32_1 : i32
    %6 = arith.extui %5 : i1 to i32
    %7 = arith.sitofp %6 : i32 to f32
    %c0 = arith.constant 0 : index
    %c0_2 = arith.constant 0 : index
    %c0_3 = arith.constant 0 : index
    %8 = vector.load %arg2[%c0, %c0_2, %c0_3] : memref<1x8x128xf32, #tpu.memory_space<vmem>>, vector<1x8x128xf32>
    %9 = vector.shape_cast %8 : vector<1x8x128xf32> to vector<8x128xf32>
    %10 = vector.broadcast %7 : f32 to vector<8x128xf32>
    %11 = arith.mulf %9, %10 : vector<8x128xf32>
    %c0_4 = arith.constant 0 : index
    %c0_5 = arith.constant 0 : index
    %12 = vector.load %arg13[%c0_4, %c0_5] : memref<8x128xf32, #tpu.memory_space<vmem>>, vector<8x128xf32>
    %cst = arith.constant 1.000000e+00 : f32
    %13 = arith.subf %cst, %7 : f32
    %14 = vector.broadcast %13 : f32 to vector<8x128xf32>
    %15 = arith.mulf %12, %14 : vector<8x128xf32>
    %16 = arith.addf %11, %15 : vector<8x128xf32>
    %c0_6 = arith.constant 0 : index
    %c0_7 = arith.constant 0 : index
    %17 = vector.load %arg11[%c0_6, %c0_7] : memref<8x128xf32, #tpu.memory_space<vmem>>, vector<8x128xf32>
    %c0_8 = arith.constant 0 : index
    %c0_9 = arith.constant 0 : index
    %18 = vector.load %arg12[%c0_8, %c0_9] : memref<8x128xf32, #tpu.memory_space<vmem>>, vector<8x128xf32>
    %c0_10 = arith.constant 0 : index
    %c0_11 = arith.constant 0 : index
    %19 = vector.load %arg6[%c0_10, %c0_11] : memref<256x512xf32, #tpu.memory_space<vmem>>, vector<256x512xf32>
    %c0_12 = arith.constant 0 : index
    %c0_13 = arith.constant 0 : index
    %20 = vector.load %arg7[%c0_12, %c0_13] : memref<1x512xf32, #tpu.memory_space<vmem>>, vector<1x512xf32>
    %21 = tpu.concatenate %16, %17 in 1 : vector<8x128xf32>, vector<8x128xf32> -> vector<8x256xf32>
    %cst_14 = arith.constant dense<0.000000e+00> : vector<8x512xf32>
    %22 = tpu.matmul %21, %19, %cst_14 {dimension_numbers = #tpu.dot_dimension_numbers<[1], [0], [0], [1], [0, 0, 1, 1], [], []>} : vector<8x256xf32>, vector<256x512xf32>, vector<8x512xf32> -> vector<8x512xf32>
    %23 = vector.broadcast %20 : vector<1x512xf32> to vector<8x512xf32>
    %24 = arith.addf %22, %23 : vector<8x512xf32>
    %25 = vector.extract_strided_slice %24 {offsets = [0, 0], sizes = [8, 128], strides = [1, 1]} : vector<8x512xf32> to vector<8x128xf32>
    %26 = arith.negf %25 : vector<8x128xf32>
    %27 = math.exp %26 : vector<8x128xf32>
    %cst_15 = arith.constant 1.000000e+00 : f32
    %28 = vector.broadcast %cst_15 : f32 to vector<8x128xf32>
    %29 = arith.addf %28, %27 : vector<8x128xf32>
    %30 = arith.divf %28, %29 : vector<8x128xf32>
    %31 = vector.extract_strided_slice %24 {offsets = [0, 128], sizes = [8, 128], strides = [1, 1]} : vector<8x512xf32> to vector<8x128xf32>
    %32 = arith.negf %31 : vector<8x128xf32>
    %33 = math.exp %32 : vector<8x128xf32>
    %cst_16 = arith.constant 1.000000e+00 : f32
    %34 = vector.broadcast %cst_16 : f32 to vector<8x128xf32>
    %35 = arith.addf %34, %33 : vector<8x128xf32>
    %36 = arith.divf %34, %35 : vector<8x128xf32>
    %37 = vector.extract_strided_slice %24 {offsets = [0, 256], sizes = [8, 128], strides = [1, 1]} : vector<8x512xf32> to vector<8x128xf32>
    %38 = math.tanh %37 : vector<8x128xf32>
    %39 = vector.extract_strided_slice %24 {offsets = [0, 384], sizes = [8, 128], strides = [1, 1]} : vector<8x512xf32> to vector<8x128xf32>
    %40 = arith.negf %39 : vector<8x128xf32>
    %41 = math.exp %40 : vector<8x128xf32>
    %cst_17 = arith.constant 1.000000e+00 : f32
    %42 = vector.broadcast %cst_17 : f32 to vector<8x128xf32>
    %43 = arith.addf %42, %41 : vector<8x128xf32>
    %44 = arith.divf %42, %43 : vector<8x128xf32>
    %45 = arith.mulf %36, %18 : vector<8x128xf32>
    %46 = arith.mulf %30, %38 : vector<8x128xf32>
    %47 = arith.addf %45, %46 : vector<8x128xf32>
    %48 = math.tanh %47 : vector<8x128xf32>
    %49 = arith.mulf %44, %48 : vector<8x128xf32>
    %c0_18 = arith.constant 0 : index
    %c0_19 = arith.constant 0 : index
    %50 = vector.load %arg8[%c0_18, %c0_19] : memref<128x128xf32, #tpu.memory_space<vmem>>, vector<128x128xf32>
    %cst_20 = arith.constant dense<0.000000e+00> : vector<8x128xf32>
    %51 = tpu.matmul %49, %50, %cst_20 {dimension_numbers = #tpu.dot_dimension_numbers<[1], [0], [0], [1], [0, 0, 1, 1], [], []>} : vector<8x128xf32>, vector<128x128xf32>, vector<8x128xf32> -> vector<8x128xf32>
    %c0_21 = arith.constant 0 : index
    %c0_22 = arith.constant 0 : index
    %52 = vector.load %arg9[%c0_21, %c0_22] : memref<1x128xf32, #tpu.memory_space<vmem>>, vector<1x128xf32>
    %53 = vector.broadcast %52 : vector<1x128xf32> to vector<8x128xf32>
    %54 = arith.addf %51, %53 : vector<8x128xf32>
    %c0_23 = arith.constant 0 : index
    %c0_24 = arith.constant 0 : index
    %c0_25 = arith.constant 0 : index
    %55 = vector.load %arg10[%c0_23, %c0_24, %c0_25] : memref<1x8x128xf32, #tpu.memory_space<vmem>>, vector<1x8x128xf32>
    %56 = vector.shape_cast %55 : vector<1x8x128xf32> to vector<8x128xf32>
    %57 = vector.shape_cast %54 : vector<8x128xf32> to vector<1x8x128xf32>
    tpu.vector_store %arg10[%c0_23, %c0_24, %c0_25], %57 {strides = array<i32>} : memref<1x8x128xf32, #tpu.memory_space<vmem>>, vector<1x8x128xf32>,
    %c0_26 = arith.constant 0 : index
    %c0_27 = arith.constant 0 : index
    %58 = vector.load %arg11[%c0_26, %c0_27] : memref<8x128xf32, #tpu.memory_space<vmem>>, vector<8x128xf32>
    tpu.vector_store %arg11[%c0_26, %c0_27], %49 {strides = array<i32>} : memref<8x128xf32, #tpu.memory_space<vmem>>, vector<8x128xf32>,
    %c0_28 = arith.constant 0 : index
    %c0_29 = arith.constant 0 : index
    %59 = vector.load %arg12[%c0_28, %c0_29] : memref<8x128xf32, #tpu.memory_space<vmem>>, vector<8x128xf32>
    tpu.vector_store %arg12[%c0_28, %c0_29], %47 {strides = array<i32>} : memref<8x128xf32, #tpu.memory_space<vmem>>, vector<8x128xf32>,
    %60 = tpu.iota {dimensions = array<i32: 1>} : vector<8x128xi32>
    %cst_30 = arith.constant dense<0xFF800000> : vector<8xf32>
    %61 = vector.multi_reduction <maximumf>, %54, %cst_30 [1] : vector<8x128xf32> to vector<8xf32>
    %62 = vector.shape_cast %61 : vector<8xf32> to vector<8x1xf32>
    %63 = vector.broadcast %62 : vector<8x1xf32> to vector<8x128xf32>
    %64 = arith.cmpf oeq, %54, %63 : vector<8x128xf32>
    %c128_i32 = arith.constant 128 : i32
    %65 = vector.broadcast %c128_i32 : i32 to vector<8x128xi32>
    %66 = arith.select %64, %60, %65 : vector<8x128xi1>, vector<8x128xi32>
    %cst_31 = arith.constant dense<2147483647> : vector<8xi32>
    %67 = vector.multi_reduction <minsi>, %66, %cst_31 [1] : vector<8x128xi32> to vector<8xi32>
    %68 = vector.shape_cast %67 : vector<8xi32> to vector<8x1xi32>
    %69 = vector.broadcast %68 : vector<8x1xi32> to vector<8x128xi32>
    %70 = arith.cmpi eq, %60, %69 : vector<8x128xi32>
    %71 = arith.extui %70 : vector<8x128xi1> to vector<8x128xi32>
    %72 = arith.sitofp %71 : vector<8x128xi32> to vector<8x128xf32>
    %c0_32 = arith.constant 0 : index
    %c0_33 = arith.constant 0 : index
    %73 = vector.load %arg5[%c0_32, %c0_33] : memref<128x128xf32, #tpu.memory_space<vmem>>, vector<128x128xf32>
    %cst_34 = arith.constant dense<0.000000e+00> : vector<8x128xf32>
    %74 = tpu.matmul %72, %73, %cst_34 {dimension_numbers = #tpu.dot_dimension_numbers<[1], [0], [0], [1], [0, 0, 1, 1], [], []>} : vector<8x128xf32>, vector<128x128xf32>, vector<8x128xf32> -> vector<8x128xf32>
    %c0_35 = arith.constant 0 : index
    %c0_36 = arith.constant 0 : index
    %75 = vector.load %arg13[%c0_35, %c0_36] : memref<8x128xf32, #tpu.memory_space<vmem>>, vector<8x128xf32>
    tpu.vector_store %arg13[%c0_35, %c0_36], %74 {strides = array<i32>} : memref<8x128xf32, #tpu.memory_space<vmem>>, vector<8x128xf32>,
    return
  }
  func.func @transform_0(%arg0: i32, %arg1: memref<7xi32, #tpu.memory_space<smem>>) -> (i32, i32, i32) {
    %c0_i32 = arith.constant 0 : i32
    %c0_i32_0 = arith.constant 0 : i32
    %c0_i32_1 = arith.constant 0 : i32
    return %arg0, %c0_i32, %c0_i32_0 : i32, i32, i32
  }
  func.func @transform_1(%arg0: i32, %arg1: memref<7xi32, #tpu.memory_space<smem>>) -> (i32, i32) {
    %c0_i32 = arith.constant 0 : i32
    %c0_i32_0 = arith.constant 0 : i32
    %c0_i32_1 = arith.constant 0 : i32
    return %c0_i32, %c0_i32_0 : i32, i32
  }
  func.func @transform_2(%arg0: i32, %arg1: memref<7xi32, #tpu.memory_space<smem>>) -> (i32, i32) {
    %c0_i32 = arith.constant 0 : i32
    %c0_i32_0 = arith.constant 0 : i32
    %c0_i32_1 = arith.constant 0 : i32
    return %c0_i32, %c0_i32_0 : i32, i32
  }
  func.func @transform_3(%arg0: i32, %arg1: memref<7xi32, #tpu.memory_space<smem>>) -> (i32, i32) {
    %c0_i32 = arith.constant 0 : i32
    %c0_i32_0 = arith.constant 0 : i32
    %c0_i32_1 = arith.constant 0 : i32
    return %c0_i32, %c0_i32_0 : i32, i32
  }
  func.func @transform_4(%arg0: i32, %arg1: memref<7xi32, #tpu.memory_space<smem>>) -> (i32, i32) {
    %c0_i32 = arith.constant 0 : i32
    %c0_i32_0 = arith.constant 0 : i32
    %c0_i32_1 = arith.constant 0 : i32
    return %c0_i32, %c0_i32_0 : i32, i32
  }
  func.func @transform_5(%arg0: i32, %arg1: memref<7xi32, #tpu.memory_space<smem>>) -> (i32, i32) {
    %c0_i32 = arith.constant 0 : i32
    %c0_i32_0 = arith.constant 0 : i32
    %c0_i32_1 = arith.constant 0 : i32
    return %c0_i32, %c0_i32_0 : i32, i32
  }
  func.func @transform_6(%arg0: i32, %arg1: memref<7xi32, #tpu.memory_space<smem>>) -> (i32, i32) {
    %c0_i32 = arith.constant 0 : i32
    %c0_i32_0 = arith.constant 0 : i32
    %c0_i32_1 = arith.constant 0 : i32
    return %c0_i32, %c0_i32_0 : i32, i32
  }
  func.func @transform_7(%arg0: i32, %arg1: memref<7xi32, #tpu.memory_space<smem>>) -> (i32, i32) {
    %c0_i32 = arith.constant 0 : i32
    %c0_i32_0 = arith.constant 0 : i32
    %c0_i32_1 = arith.constant 0 : i32
    return %c0_i32, %c0_i32_0 : i32, i32
  }
  func.func @transform_8(%arg0: i32, %arg1: memref<7xi32, #tpu.memory_space<smem>>) -> (i32, i32, i32) {
    %c0_i32 = arith.constant 0 : i32
    %c0_i32_0 = arith.constant 0 : i32
    %c0_i32_1 = arith.constant 0 : i32
    return %arg0, %c0_i32, %c0_i32_0 : i32, i32, i32
  }
}

</mosaic_0001>

<bundles_post_ra>
// kernel: _forward_impl.2
= control target key start
LH: loop header
LB: loop body
LE: loop exit
PB: predicated region body
PF: predicated region fallthrough
CT: control target
= control target key end

     0   :  { %s737_s15 = smov 0   ;;  %s1159_s0 = inlined_call_operand.vmem [shape: f32[8,8,128], index: 0, kind: input, shape index: {}]   ;;  %s1160_s1 = inlined_call_operand.vmem [shape: f32[256,512], index: 1, kind: input, shape index: {}]   ;;  %s1161_s2 = inlined_call_operand.vmem [shape: f32[1,512], index: 2, kind: input, shape index: {}]   ;;  %s1162_s3 = inlined_call_operand.vmem [shape: f32[8,128], index: 3, kind: output, shape index: {0}]   ;;  %s1163_s4 = inlined_call_operand.vmem [shape: f32[8,128], index: 4, kind: output, shape index: {1}]  }
   0x1 LB: > { %s539_s16 = sadd.s32 4294967295, %s709_s15   ;;  %p542_p0 = scmp.ge.s32.totalorder %s709_s15, 1  ;;  %s709_s15 = sphi %s737_s15, %s15_s15  }
   0x2   : > { %p154_p1 = scmp.lt.s32.totalorder %s709_s15, 9 }
   0x4   : > { %p155_p2 = pnand %p542_p0, %p154_p1 }
   0x5   : > { %p174_p3 = scmp.lt.s32.totalorder (!%p155_p2), %s539_s16, 7  ;;  %p544_p4 = scmp.ne.s32.totalorder (!%p155_p2), %s539_s16, 0 }
   0x6   : > { %158 = sbr.rel (%p155_p2) target bundleno = 348 (0x15c), region = 32 }
   0xd   : > { %s175_s17 = scalar_select %p174_p3, %s539_s16, 7 }
   0xe   : > { %181 = sbr.rel (%p544_p4) target bundleno = 21 (0x15), region = 36  ;;  %v711_v0 = vmov (!%p544_p4), 0.0  }
   0xf   : > { %s543_s18 = sshll.u32 %s175_s17, 3  ;;  %182 = vst [vmem:[%s1162_s3] sm:$0xff] (!%p544_p4), %v711_v0  ;;  %183 = vst [vmem:[%s1163_s4] sm:$0xff] (!%p544_p4), %v711_v0 }
  0x10   : > { %s748_s21 = scalar_lea.vmem %s1159_s0, %s543_s18 }
  0x15 PF: > { %v188_v1 = vld [vmem:[%s1160_s1 + $0x8] sm:$0xff]  ;;  %v187_v3 = vld [vmem:[%s1160_s1] sm:$0xff]  ;;  %v190_v19 = vld [vmem:[%s1160_s1 + $0x18] sm:$0xff] }
  0x16   : > { %v192_v2 = vld [vmem:[%s1160_s1 + $0x28] sm:$0xff]  ;;  %v191_v5 = vld [vmem:[%s1160_s1 + $0x20] sm:$0xff]  ;;  %v194_v20 = vld [vmem:[%s1160_s1 + $0x38] sm:$0xff] }
  0x17   : > { %v550_v4 = vpack.c.bf16 %v192_v2, %v188_v1  ;;  %v196_v6 = vld [vmem:[%s1160_s1 + $0x48] sm:$0xff]  ;;  %v552_v8 = vpack.c.bf16 %v191_v5, %v187_v3  ;;  %v195_v10 = vld [vmem:[%s1160_s1 + $0x40] sm:$0xff]  ;;  %v614_v22 = vpack.c.bf16 %v194_v20, %v190_v19  ;;  %v189_v23 = vld [vmem:[%s1160_s1 + $0x10] sm:$0xff] }
  0x18   : > { %v200_v7 = vld [vmem:[%s1160_s1 + $0x68] sm:$0xff]  ;;  %v199_v11 = vld [vmem:[%s1160_s1 + $0x60] sm:$0xff]  ;;  %v193_v24 = vld [vmem:[%s1160_s1 + $0x30] sm:$0xff] }
  0x19   : > { %v554_v9 = vpack.c.bf16 %v200_v7, %v196_v6  ;;  %v204_v12 = vld [vmem:[%s1160_s1 + $0x88] sm:$0xff]  ;;  %551 = vmatprep.subr.bf16.mxu0 %v550_v4  ;;  %v556_v14 = vpack.c.bf16 %v199_v11, %v195_v10  ;;  %v203_v15 = vld [vmem:[%s1160_s1 + $0x80] sm:$0xff]  ;;  %v616_v25 = vpack.c.bf16 %v193_v24, %v189_v23  ;;  %615 = vmatprep.subr.bf16.mxu1 %v614_v22  ;;  %v198_v27 = vld [vmem:[%s1160_s1 + $0x58] sm:$0xff] }
  0x1a   : > { %v208_v13 = vld [vmem:[%s1160_s1 + $0xa8] sm:$0xff]  ;;  %553 = vmatpush1.bf16.msra.mxu0 %v552_v8  ;;  %v207_v16 = vld [vmem:[%s1160_s1 + $0xa0] sm:$0xff]  ;;  %v202_v28 = vld [vmem:[%s1160_s1 + $0x78] sm:$0xff] }
  0x1b   : > { %555 = vmatprep.subr.bf16.mxu0 %v554_v9  ;;  %v558_v17 = vpack.c.bf16 %v208_v13, %v204_v12  ;;  %v212_v18 = vld [vmem:[%s1160_s1 + $0xc8] sm:$0xff]  ;;  %v560_v26 = vpack.c.bf16 %v207_v16, %v203_v15  ;;  %v197_v29 = vld [vmem:[%s1160_s1 + $0x50] sm:$0xff]  ;;  %v211_v31 = vld [vmem:[%s1160_s1 + $0xc0] sm:$0xff]  ;;  %617 = vmatpush1.bf16.msra.mxu1 %v616_v25  ;;  %v618_v33 = vpack.c.bf16 %v202_v28, %v198_v27 }
  0x1c   : > { %v216_v21 = vld [vmem:[%s1160_s1 + $0xe8] sm:$0xff]  ;;  %v215_v32 = vld [vmem:[%s1160_s1 + $0xe0] sm:$0xff]  ;;  %v201_v34 = vld [vmem:[%s1160_s1 + $0x70] sm:$0xff] }
  0x1d   : > { %v562_v30 = vpack.c.bf16 %v216_v21, %v212_v18  ;;  %v220_v35 = vld [vmem:[%s1160_s1 + $0x108] sm:$0xff]  ;;  %v620_v37 = vpack.c.bf16 %v201_v34, %v197_v29  ;;  %v206_v38 = vld [vmem:[%s1160_s1 + $0x98] sm:$0xff]  ;;  %619 = vmatprep.subr.bf16.mxu1 %v618_v33  ;;  %v205_v40 = vld [vmem:[%s1160_s1 + $0x90] sm:$0xff]  ;;  %v564_v42 = vpack.c.bf16 %v215_v32, %v211_v31 }
  0x1e   : > { %557 = vmatpush1.bf16.msra.mxu0 %v556_v14  ;;  %v224_v36 = vld [vmem:[%s1160_s1 + $0x128] sm:$0xff]  ;;  %v210_v39 = vld [vmem:[%s1160_s1 + $0xb8] sm:$0xff]  ;;  %v209_v41 = vld [vmem:[%s1160_s1 + $0xb0] sm:$0xff] }
  0x1f   : > { %559 = vmatprep.subr.bf16.mxu0 %v558_v17  ;;  %v219_v43 = vld [vmem:[%s1160_s1 + $0x100] sm:$0xff]  ;;  %v622_v45 = vpack.c.bf16 %v210_v39, %v206_v38  ;;  %v566_v46 = vpack.c.bf16 %v224_v36, %v220_v35  ;;  %621 = vmatpush1.bf16.msra.mxu1 %v620_v37  ;;  %v228_v47 = vld [vmem:[%s1160_s1 + $0x148] sm:$0xff]  ;;  %v624_v48 = vpack.c.bf16 %v209_v41, %v205_v40  ;;  %v214_v49 = vld [vmem:[%s1160_s1 + $0xd8] sm:$0xff] }
  0x20   : > { %v223_v44 = vld [vmem:[%s1160_s1 + $0x120] sm:$0xff]  ;;  %v218_v50 = vld [vmem:[%s1160_s1 + $0xf8] sm:$0xff]  ;;  %v232_v51 = vld [vmem:[%s1160_s1 + $0x168] sm:$0xff] }
  0x21   : > { %623 = vmatprep.subr.bf16.mxu1 %v622_v45  ;;  %v626_v52 = vpack.c.bf16 %v218_v50, %v214_v49  ;;  %v213_v53 = vld [vmem:[%s1160_s1 + $0xd0] sm:$0xff]  ;;  %v568_v55 = vpack.c.bf16 %v223_v44, %v219_v43  ;;  %v222_v56 = vld [vmem:[%s1160_s1 + $0x118] sm:$0xff]  ;;  %v570_v58 = vpack.c.bf16 %v232_v51, %v228_v47  ;;  %v227_v59 = vld [vmem:[%s1160_s1 + $0x140] sm:$0xff] }
  0x22   : > { %561 = vmatpush1.bf16.msra.mxu0 %v560_v26  ;;  %v217_v54 = vld [vmem:[%s1160_s1 + $0xf0] sm:$0xff]  ;;  %v226_v57 = vld [vmem:[%s1160_s1 + $0x138] sm:$0xff]  ;;  %v231_v60 = vld [vmem:[%s1160_s1 + $0x160] sm:$0xff] }
  0x23   : > { %563 = vmatprep.subr.bf16.mxu0 %v562_v30  ;;  %625 = vmatpush1.bf16.msra.mxu1 %v624_v48  ;;  %v236_v61 = vld [vmem:[%s1160_s1 + $0x188] sm:$0xff]  ;;  %v628_v62 = vpack.c.bf16 %v217_v54, %v213_v53  ;;  %v630_v0 = vpack.c.bf16 %v226_v57, %v222_v56  ;;  %v221_v1 = vld [vmem:[%s1160_s1 + $0x110] sm:$0xff]  ;;  %v230_v3 = vld [vmem:[%s1160_s1 + $0x158] sm:$0xff]  ;;  %v572_v5 = vpack.c.bf16 %v231_v60, %v227_v59 }
  0x24   : > { %v240_v63 = vld [vmem:[%s1160_s1 + $0x1a8] sm:$0xff]  ;;  %627 = vmatprep.subr.bf16.mxu1 %v626_v52  ;;  %v225_v2 = vld [vmem:[%s1160_s1 + $0x130] sm:$0xff]  ;;  %v234_v4 = vld [vmem:[%s1160_s1 + $0x178] sm:$0xff] }
  0x25   : > { %v574_v6 = vpack.c.bf16 %v240_v63, %v236_v61  ;;  %v235_v7 = vld [vmem:[%s1160_s1 + $0x180] sm:$0xff]  ;;  %v244_v9 = vld [vmem:[%s1160_s1 + $0x1c8] sm:$0xff]  ;;  %v632_v10 = vpack.c.bf16 %v225_v2, %v221_v1  ;;  %v634_v12 = vpack.c.bf16 %v234_v4, %v230_v3  ;;  %v229_v13 = vld [vmem:[%s1160_s1 + $0x150] sm:$0xff] }
  0x26   : > { %565 = vmatpush1.bf16.msra.mxu0 %v564_v42  ;;  %v239_v8 = vld [vmem:[%s1160_s1 + $0x1a0] sm:$0xff]  ;;  %v248_v11 = vld [vmem:[%s1160_s1 + $0x1e8] sm:$0xff]  ;;  %v233_v14 = vld [vmem:[%s1160_s1 + $0x170] sm:$0xff] }
  0x27   : > { %567 = vmatprep.subr.bf16.mxu0 %v566_v46  ;;  %629 = vmatpush1.bf16.msra.mxu1 %v628_v62  ;;  %v238_v15 = vld [vmem:[%s1160_s1 + $0x198] sm:$0xff]  ;;  %v576_v17 = vpack.c.bf16 %v239_v8, %v235_v7  ;;  %v578_v18 = vpack.c.bf16 %v248_v11, %v244_v9  ;;  %v243_v19 = vld [vmem:[%s1160_s1 + $0x1c0] sm:$0xff]  ;;  %v252_v21 = vld [vmem:[%s1160_s1 + $0x208] sm:$0xff]  ;;  %v636_v22 = vpack.c.bf16 %v233_v14, %v229_v13 }
  0x28   : > { %631 = vmatprep.subr.bf16.mxu1 %v630_v0  ;;  %v242_v16 = vld [vmem:[%s1160_s1 + $0x1b8] sm:$0xff]  ;;  %v247_v20 = vld [vmem:[%s1160_s1 + $0x1e0] sm:$0xff]  ;;  %v256_v23 = vld [vmem:[%s1160_s1 + $0x228] sm:$0xff] }
  0x29   : > { %v638_v24 = vpack.c.bf16 %v242_v16, %v238_v15  ;;  %v237_v25 = vld [vmem:[%s1160_s1 + $0x190] sm:$0xff]  ;;  %v246_v27 = vld [vmem:[%s1160_s1 + $0x1d8] sm:$0xff]  ;;  %v580_v29 = vpack.c.bf16 %v247_v20, %v243_v19  ;;  %v582_v30 = vpack.c.bf16 %v256_v23, %v252_v21  ;;  %v251_v31 = vld [vmem:[%s1160_s1 + $0x200] sm:$0xff] }
  0x2a   : > { %569 = vmatpush1.bf16.msra.mxu0 %v568_v55  ;;  %v241_v26 = vld [vmem:[%s1160_s1 + $0x1b0] sm:$0xff]  ;;  %v250_v28 = vld [vmem:[%s1160_s1 + $0x1f8] sm:$0xff]  ;;  %v255_v32 = vld [vmem:[%s1160_s1 + $0x220] sm:$0xff] }
  0x2b   : > { %571 = vmatprep.subr.bf16.mxu0 %v570_v58  ;;  %633 = vmatpush1.bf16.msra.mxu1 %v632_v10  ;;  %v260_v33 = vld [vmem:[%s1160_s1 + $0x248] sm:$0xff]  ;;  %v640_v34 = vpack.c.bf16 %v241_v26, %v237_v25  ;;  %v642_v36 = vpack.c.bf16 %v250_v28, %v246_v27  ;;  %v245_v37 = vld [vmem:[%s1160_s1 + $0x1d0] sm:$0xff]  ;;  %v254_v39 = vld [vmem:[%s1160_s1 + $0x218] sm:$0xff]  ;;  %v584_v41 = vpack.c.bf16 %v255_v32, %v251_v31 }
  0x2c   : > { %635 = vmatprep.subr.bf16.mxu1 %v634_v12  ;;  %v264_v35 = vld [vmem:[%s1160_s1 + $0x268] sm:$0xff]  ;;  %v249_v38 = vld [vmem:[%s1160_s1 + $0x1f0] sm:$0xff]  ;;  %v258_v40 = vld [vmem:[%s1160_s1 + $0x238] sm:$0xff] }
  0x2d   : > { %v586_v42 = vpack.c.bf16 %v264_v35, %v260_v33  ;;  %v259_v43 = vld [vmem:[%s1160_s1 + $0x240] sm:$0xff]  ;;  %v268_v45 = vld [vmem:[%s1160_s1 + $0x288] sm:$0xff]  ;;  %v644_v46 = vpack.c.bf16 %v249_v38, %v245_v37  ;;  %v646_v48 = vpack.c.bf16 %v258_v40, %v254_v39  ;;  %v253_v49 = vld [vmem:[%s1160_s1 + $0x210] sm:$0xff] }
  0x2e   : > { %573 = vmatpush1.bf16.msra.mxu0 %v572_v5  ;;  %v263_v44 = vld [vmem:[%s1160_s1 + $0x260] sm:$0xff]  ;;  %v272_v47 = vld [vmem:[%s1160_s1 + $0x2a8] sm:$0xff]  ;;  %v257_v50 = vld [vmem:[%s1160_s1 + $0x230] sm:$0xff] }
  0x2f   : > { %575 = vmatprep.subr.bf16.mxu0 %v574_v6  ;;  %637 = vmatpush1.bf16.msra.mxu1 %v636_v22  ;;  %v262_v51 = vld [vmem:[%s1160_s1 + $0x258] sm:$0xff]  ;;  %v588_v53 = vpack.c.bf16 %v263_v44, %v259_v43  ;;  %v267_v54 = vld [vmem:[%s1160_s1 + $0x280] sm:$0xff]  ;;  %v590_v55 = vpack.c.bf16 %v272_v47, %v268_v45  ;;  %v276_v57 = vld [vmem:[%s1160_s1 + $0x2c8] sm:$0xff]  ;;  %v648_v59 = vpack.c.bf16 %v257_v50, %v253_v49 }
  0x30   : > { %639 = vmatprep.subr.bf16.mxu1 %v638_v24  ;;  %v266_v52 = vld [vmem:[%s1160_s1 + $0x278] sm:$0xff]  ;;  %v271_v56 = vld [vmem:[%s1160_s1 + $0x2a0] sm:$0xff]  ;;  %v280_v58 = vld [vmem:[%s1160_s1 + $0x2e8] sm:$0xff] }
  0x31   : > { %v650_v60 = vpack.c.bf16 %v266_v52, %v262_v51  ;;  %v261_v61 = vld [vmem:[%s1160_s1 + $0x250] sm:$0xff]  ;;  %v185_v63 = vld [vmem:[%s1162_s3] sm:$0xff]  ;;  %v270_v0 = vld [vmem:[%s1160_s1 + $0x298] sm:$0xff]  ;;  %v592_v2 = vpack.c.bf16 %v271_v56, %v267_v54  ;;  %v594_v3 = vpack.c.bf16 %v280_v58, %v276_v57 }
  0x32   : > { %577 = vmatpush1.bf16.msra.mxu0 %v576_v17  ;;  %v265_v62 = vld [vmem:[%s1160_s1 + $0x270] sm:$0xff]  ;;  %v274_v1 = vld [vmem:[%s1160_s1 + $0x2b8] sm:$0xff]  ;;  %401 = vmatprep.mubr.f32.mxu0 %v185_v63  ;;  %v275_v4 = vld [vmem:[%s1160_s1 + $0x2c0] sm:$0xff] }
  0x33   : > { %579 = vmatprep.subr.bf16.mxu0 %v578_v18  ;;  %641 = vmatpush1.bf16.msra.mxu1 %v640_v34  ;;  %v279_v5 = vld [vmem:[%s1160_s1 + $0x2e0] sm:$0xff]  ;;  %v284_v6 = vld [vmem:[%s1160_s1 + $0x308] sm:$0xff]  ;;  %v652_v7 = vpack.c.bf16 %v265_v62, %v261_v61  ;;  %v654_v9 = vpack.c.bf16 %v274_v1, %v270_v0  ;;  %v269_v10 = vld [vmem:[%s1160_s1 + $0x290] sm:$0xff] }
  0x34   : > { %643 = vmatprep.subr.bf16.mxu1 %v642_v36  ;;  %472 = vmatprep.mubr.f32.mxu1 %v185_v63  ;;  %v288_v8 = vld [vmem:[%s1160_s1 + $0x328] sm:$0xff]  ;;  %v273_v11 = vld [vmem:[%s1160_s1 + $0x2b0] sm:$0xff]  ;;  %v278_v12 = vld [vmem:[%s1160_s1 + $0x2d8] sm:$0xff]  ;;  %v596_v14 = vpack.c.bf16 %v279_v5, %v275_v4 }
  0x35   : > { %v282_v13 = vld [vmem:[%s1160_s1 + $0x2f8] sm:$0xff]  ;;  %v598_v15 = vpack.c.bf16 %v288_v8, %v284_v6  ;;  %v283_v16 = vld [vmem:[%s1160_s1 + $0x300] sm:$0xff]  ;;  %v292_v18 = vld [vmem:[%s1160_s1 + $0x348] sm:$0xff]  ;;  %v656_v19 = vpack.c.bf16 %v273_v11, %v269_v10 }
  0x36   : > { %581 = vmatpush1.bf16.msra.mxu0 %v580_v29  ;;  %v287_v17 = vld [vmem:[%s1160_s1 + $0x320] sm:$0xff]  ;;  %v296_v20 = vld [vmem:[%s1160_s1 + $0x368] sm:$0xff]  ;;  %v658_v21 = vpack.c.bf16 %v282_v13, %v278_v12  ;;  %v277_v22 = vld [vmem:[%s1160_s1 + $0x2d0] sm:$0xff] }
  0x37   : > { %583 = vmatprep.subr.bf16.mxu0 %v582_v30  ;;  %645 = vmatpush1.bf16.msra.mxu1 %v644_v46  ;;  %v281_v23 = vld [vmem:[%s1160_s1 + $0x2f0] sm:$0xff]  ;;  %v286_v24 = vld [vmem:[%s1160_s1 + $0x318] sm:$0xff]  ;;  %v600_v26 = vpack.c.bf16 %v287_v17, %v283_v16  ;;  %v602_v27 = vpack.c.bf16 %v296_v20, %v292_v18  ;;  %v291_v28 = vld [vmem:[%s1160_s1 + $0x340] sm:$0xff] }
  0x38   : > { %647 = vmatprep.subr.bf16.mxu1 %v646_v48  ;;  %v290_v25 = vld [vmem:[%s1160_s1 + $0x338] sm:$0xff]  ;;  %v295_v29 = vld [vmem:[%s1160_s1 + $0x360] sm:$0xff]  ;;  %v300_v30 = vld [vmem:[%s1160_s1 + $0x388] sm:$0xff]  ;;  %v660_v31 = vpack.c.bf16 %v281_v23, %v277_v22 }
  0x39   : > { %v304_v32 = vld [vmem:[%s1160_s1 + $0x3a8] sm:$0xff]  ;;  %v662_v33 = vpack.c.bf16 %v290_v25, %v286_v24  ;;  %v285_v34 = vld [vmem:[%s1160_s1 + $0x310] sm:$0xff]  ;;  %v294_v36 = vld [vmem:[%s1160_s1 + $0x358] sm:$0xff]  ;;  %v604_v38 = vpack.c.bf16 %v295_v29, %v291_v28 }
  0x3a   : > { %585 = vmatpush1.bf16.msra.mxu0 %v584_v41  ;;  %v289_v35 = vld [vmem:[%s1160_s1 + $0x330] sm:$0xff]  ;;  %v298_v37 = vld [vmem:[%s1160_s1 + $0x378] sm:$0xff]  ;;  %v606_v39 = vpack.c.bf16 %v304_v32, %v300_v30  ;;  %v299_v40 = vld [vmem:[%s1160_s1 + $0x380] sm:$0xff] }
  0x3b   : > { %587 = vmatprep.subr.bf16.mxu0 %v586_v42  ;;  %649 = vmatpush1.bf16.msra.mxu1 %v648_v59  ;;  %v303_v41 = vld [vmem:[%s1160_s1 + $0x3a0] sm:$0xff]  ;;  %v308_v42 = vld [vmem:[%s1160_s1 + $0x3c8] sm:$0xff]  ;;  %v664_v43 = vpack.c.bf16 %v289_v35, %v285_v34  ;;  %v666_v45 = vpack.c.bf16 %v298_v37, %v294_v36  ;;  %v293_v46 = vld [vmem:[%s1160_s1 + $0x350] sm:$0xff] }
  0x3c   : > { %651 = vmatprep.subr.bf16.mxu1 %v650_v60  ;;  %v312_v44 = vld [vmem:[%s1160_s1 + $0x3e8] sm:$0xff]  ;;  %v297_v47 = vld [vmem:[%s1160_s1 + $0x370] sm:$0xff]  ;;  %v302_v48 = vld [vmem:[%s1160_s1 + $0x398] sm:$0xff]  ;;  %v608_v50 = vpack.c.bf16 %v303_v41, %v299_v40 }
  0x3d   : > { %v306_v49 = vld [vmem:[%s1160_s1 + $0x3b8] sm:$0xff]  ;;  %v610_v51 = vpack.c.bf16 %v312_v44, %v308_v42  ;;  %v307_v52 = vld [vmem:[%s1160_s1 + $0x3c0] sm:$0xff]  ;;  %v668_v54 = vpack.c.bf16 %v297_v47, %v293_v46  ;;  %v301_v56 = vld [vmem:[%s1160_s1 + $0x390] sm:$0xff] }
  0x3e   : > { %589 = vmatpush1.bf16.msra.mxu0 %v588_v53  ;;  %v311_v53 = vld [vmem:[%s1160_s1 + $0x3e0] sm:$0xff]  ;;  %v305_v57 = vld [vmem:[%s1160_s1 + $0x3b0] sm:$0xff]  ;;  %v310_v58 = vld [vmem:[%s1160_s1 + $0x3d8] sm:$0xff] }
  0x3f   : > { %591 = vmatprep.subr.bf16.mxu0 %v590_v55  ;;  %653 = vmatpush1.bf16.msra.mxu1 %v652_v7  ;;  %v670_v55 = vpack.c.bf16 %v306_v49, %v302_v48  ;;  %v314_v59 = vld [vmem:[%s1160_s1 + $0x3f8] sm:$0xff]  ;;  %v612_v60 = vpack.c.bf16 %v311_v53, %v307_v52  ;;  %v672_v61 = vpack.c.bf16 %v305_v57, %v301_v56  ;;  %v309_v63 = vld [vmem:[%s1160_s1 + $0x3d0] sm:$0xff]  ;;  %v184_v1 = vld [vmem:[%s748_s21] sm:$0xff] }
  0x40   : > { %655 = vmatprep.subr.bf16.mxu1 %v654_v9  ;;  %v674_v62 = vpack.c.bf16 %v314_v59, %v310_v58  ;;  %v313_v0 = vld [vmem:[%s1160_s1 + $0x3f0] sm:$0xff]  ;;  %v315_v6 = vld [vmem:[%s1161_s2] sm:$0xf] }
  0x42   : > { %593 = vmatpush1.bf16.msra.mxu0 %v592_v2  ;;  %v676_v2 = vpack.c.bf16 %v313_v0, %v309_v63 }
  0x43   : > { %595 = vmatprep.subr.bf16.mxu0 %v594_v3  ;;  %657 = vmatpush1.bf16.msra.mxu1 %v656_v19  ;;  %v317_v3 = vlaneseq }
  0x44   : > { %659 = vmatprep.subr.bf16.mxu1 %v658_v21 }
  0x45   : > { %v318_v4 = vshrl.u32 %v317_v3, 7 }
  0x46   : > { %597 = vmatpush1.bf16.msra.mxu0 %v596_v14 }
  0x47   : > { %599 = vmatprep.subr.bf16.mxu0 %v598_v15  ;;  %661 = vmatpush1.bf16.msra.mxu1 %v660_v31  ;;  %v319_v5 = vsub.s32 0, %v318_v4  ;;  %v323_v7 = vsub.s32 1, %v318_v4  ;;  %v331_v10 = vsub.s32 3, %v318_v4  ;;  %v327_v18 = vsub.s32 2, %v318_v4  ;;  %v186_v31 = vld [vmem:[%s1163_s4] sm:$0xff] }
  0x48   : > { %663 = vmatprep.subr.bf16.mxu1 %v662_v33 }
  0x49   : > { %v320_v8 = vrot.slane %v315_v6, %v319_v5  ;;  %v324_v9 = vrot.slane %v315_v6, %v323_v7  ;;  %v332_v16 = vrot.slane %v315_v6, %v331_v10  ;;  %v328_v22 = vrot.slane %v315_v6, %v327_v18 }
  0x4a   : > { %601 = vmatpush1.bf16.msra.mxu0 %v600_v26 }
  0x4b   : > { %603 = vmatprep.subr.bf16.mxu0 %v602_v27  ;;  %665 = vmatpush1.bf16.msra.mxu1 %v664_v43 }
  0x4c   : > { %667 = vmatprep.subr.bf16.mxu1 %v666_v45 }
  0x4e   : > { %605 = vmatpush1.bf16.msra.mxu0 %v604_v38 }
  0x4f   : > { %607 = vmatprep.subr.bf16.mxu0 %v606_v39  ;;  %669 = vmatpush1.bf16.msra.mxu1 %v668_v54 }
  0x50   : > { %671 = vmatprep.subr.bf16.mxu1 %v670_v55 }
  0x52   : > { %609 = vmatpush1.bf16.msra.mxu0 %v608_v50 }
  0x53   : > { %611 = vmatprep.subr.bf16.mxu0 %v610_v51  ;;  %673 = vmatpush1.bf16.msra.mxu1 %v672_v61 }
  0x54   : > { %675 = vmatprep.subr.bf16.mxu1 %v674_v62 }
  0x56   : > { %613 = vmatpush1.bf16.msra.mxu0 %v612_v60 }
  0x57   : > { %677 = vmatpush1.bf16.msra.mxu1 %v676_v2 }
  0x59   : > { %402 = vmatmul.mubr.f32.vlgmr.msra.gmra.mrb[0].mxu0 %v184_v1 }
  0x5a   : > { %473 = vmatmul.mubr.f32.vlgmr.msra.gmra.mrb[0].mxu1 %v184_v1 }
 0x12c   : > { %v403_v11 = vpop.f32.mrb[0].mxu0 }
 0x12d   : > { %v404_v12 = vadd.f32 %v403_v11, %v320_v8  ;;  %v405_v13 = vpop.f32.mrb[1].mxu0  ;;  %v474_v19 = vpop.f32.mrb[0].mxu1 }
 0x12e   : > { %v406_v14 = vadd.f32 %v405_v13, %v324_v9  ;;  %v476_v20 = vpop.f32.mrb[1].mxu1  ;;  %v475_v24 = vadd.f32 %v474_v19, %v328_v22 }
 0x12f   : > { %v545_v15 = vmul.f32 -1.442695, %v404_v12  ;;  %v477_v21 = vadd.f32 %v476_v20, %v332_v16 }
 0x130   : > { %v546_v17 = vmul.f32 -1.442695, %v406_v14 }
 0x131   : > { %687 = vpow2.f32 %v545_v15  ;;  %v547_v23 = vmul.f32 -1.442695, %v477_v21 }
 0x132   : > { %689 = vpow2.f32 %v546_v17 }
 0x133   : > { %691 = vpow2.f32 %v547_v23 }
 0x134   : > { %693 = vtanh.f32 %v475_v24 }
 0x13b   : > { %v688_v25 = vpop.eup %687 }
 0x13c   : > { %v690_v26 = vpop.eup %689  ;;  %v482_v27 = vadd.f32 1.0, %v688_v25 }
 0x13d   : > { %v488_v28 = vadd.f32 1.0, %v690_v26  ;;  %v692_v29 = vpop.eup %691 }
 0x13e   : > { %695 = vrcp.f32 %v482_v27  ;;  %v694_v30 = vpop.eup %693  ;;  %v495_v33 = vadd.f32 1.0, %v692_v29 }
 0x13f   : > { %697 = vrcp.f32 %v488_v28 }
 0x140   : > { %699 = vrcp.f32 %v495_v33 }
 0x148   : > { %v696_v32 = vpop.eup %695 }
 0x149   : > { %v698_v34 = vpop.eup %697  ;;  %v499_v35 = vmul.f32 %v696_v32, %v694_v30 }
 0x14a   : > { %v498_v36 = vmul.f32 %v698_v34, %v186_v31  ;;  %v700_v38 = vpop.eup %699 }
 0x14c   : > { %v500_v37 = vadd.f32 %v499_v35, %v498_v36 }
 0x14e   : > { %701 = vtanh.f32 %v500_v37  ;;  %504 = vst [vmem:[%s1163_s4] sm:$0xff] %v500_v37 }
 0x158   : > { %v702_v39 = vpop.eup %701 }
 0x159   : > { %v502_v40 = vmul.f32 %v702_v39, %v700_v38 }
 0x15b   : > { %503 = vst [vmem:[%s1162_s3] sm:$0xff] %v502_v40 }
 0x15c PF: > { %s15_s15 = sadd.s32 1, %s709_s15  }
 0x15d   : > { %p12_p5 = scmp.ge.s32.totalorder %s15_s15, 10  }
 0x15f   :  { %14 = sbr.rel (!%p12_p5) target bundleno = 1 (0x1), region = 70 }

// kernel: _forward_impl.3
= control target key start
LH: loop header
LB: loop body
LE: loop exit
PB: predicated region body
PF: predicated region fallthrough
CT: control target
= control target key end

     0   :  { %s1865_s0 = inlined_call_operand.vmem [shape: s32[7], index: 0, kind: input, shape index: {}]   ;;  %s1866_s1 = inlined_call_operand.vmem [shape: f32[7,8,128], index: 1, kind: input, shape index: {}]   ;;  %s1867_s2 = inlined_call_operand.vmem [shape: f32[8,128], index: 2, kind: input, shape index: {}]   ;;  %s1868_s3 = inlined_call_operand.vmem [shape: f32[8,128], index: 3, kind: input, shape index: {}]   ;;  %s1869_s4 = inlined_call_operand.vmem [shape: f32[128,128], index: 4, kind: input, shape index: {}]   ;;  %s1870_s5 = inlined_call_operand.vmem [shape: f32[256,512], index: 5, kind: input, shape index: {}]   ;;  %s1871_s6 = inlined_call_operand.vmem [shape: f32[1,512], index: 6, kind: input, shape index: {}]   ;;  %s1872_s7 = inlined_call_operand.vmem [shape: f32[128,128], index: 7, kind: input, shape index: {}]   ;;  %s1873_s8 = inlined_call_operand.vmem [shape: f32[1,128], index: 8, kind: input, shape index: {}]   ;;  %s1874_s9 = inlined_call_operand.vmem [shape: f32[7,8,128], index: 9, kind: output, shape index: {}]  }
   0x1   :  { %s14_s11 = sshll.u32 %s1865_s0, 4  ;;  %s15_s11 = int_to_ptr.vmem [resolvable:$true] %s14_s11 }
   0x2   :  { %s1232_s12 = scalar_lea.vmem %s15_s11, 16  ;;  %p1237_p1 = scmp.lt.s32.totalorder %s15_s11, %s15_s11 }
   0x3   :  { %p1233_p0 = scmp.ne.s32.totalorder %s15_s11, %s1232_s12  ;;  %p1238_p2 = scmp.lt.s32.totalorder %s1232_s12, %s1232_s12 }
   0x5   :  { %p1239_p3 = por %p1238_p2, %p1237_p1 }
   0x7   :  { %p1240_p4 = pnand %p1239_p3, %p1233_p0 }
   0x9   :  { %1243 = shalt.err (!%p1240_p4)  }
   0xa   :  { %s1254_s13 = smov [#allocation6]  }
   0xb   :  { %17 = dma.vmem_to_smem %s15_s11, 16, %s1254_s13, [#allocation5] }
   0xc   :  { %1248 = dma.done.wait [#allocation5], 16 }
   0xd   :  { %1249 = vsyncadd [#allocation5], 4294967280 }
   0xe   :  { %19 = sfence }
   0xf   :  { %s1313_s14 = smov 0  }
  0x10 LB: > { %s1319_s0 = sadd.s32 4294967295, %s1252_s14   ;;  %p910_p5 = scmp.ge.s32.totalorder %s1252_s14, 1  ;;  %s1252_s14 = sphi %s1313_s14, %s25_s14  }
  0x11   : > { %p268_p6 = scmp.lt.s32.totalorder %s1252_s14, 8 }
  0x13   : > { %p269_p7 = pnand %p910_p5, %p268_p6 }
  0x14   : > { %p300_p8 = scmp.lt.s32.totalorder (!%p269_p7), %s1319_s0, 6  ;;  %p913_p9 = scmp.ne.s32.totalorder (!%p269_p7), %s1319_s0, 0 }
  0x15   : > { %272 = sbr.rel (%p269_p7) target bundleno = 1228 (0x4cc), region = 52 }
  0x1c   : > { %s301_s15 = scalar_select %p300_p8, %s1319_s0, 6 }
  0x1d   : > { %311 = sbr.rel (%p913_p9) target bundleno = 36 (0x24), region = 56  ;;  %v312_v0 = vld [vmem:[%s1867_s2] sm:$0xff] (!%p913_p9)  ;;  %v1255_v2 = vmov (!%p913_p9), 0.0  }
  0x1e   : > { %s911_s16 = sshll.u32 %s301_s15, 3  ;;  %v314_v1 = vld [vmem:[%s1868_s3] sm:$0xff] (!%p913_p9)  ;;  %313 = vst [vmem:[#allocation2] sm:$0xff] (!%p913_p9), %v312_v0  ;;  %316 = vst [vmem:[#allocation4] sm:$0xff] (!%p913_p9), %v1255_v2 }
  0x1f   : > { %s1328_s19 = scalar_lea.vmem %s1866_s1, %s911_s16  ;;  %s1333_s22 = scalar_lea.vmem %s1874_s9, %s911_s16  ;;  %315 = vst [vmem:[#allocation3] sm:$0xff] (!%p913_p9), %v314_v1 }
  0x24 PF: > { %v332_v3 = vld [vmem:[%s1870_s5 + $0x8] sm:$0xff]  ;;  %v331_v5 = vld [vmem:[%s1870_s5] sm:$0xff]  ;;  %v334_v21 = vld [vmem:[%s1870_s5 + $0x18] sm:$0xff]  ;;  %s1559_s27 = sld [smem:[#allocation6 + %s1319_s0]]  ;;  %vm1257_vm0 = vmmov 0  }
  0x25   : > { %v336_v4 = vld [vmem:[%s1870_s5 + $0x28] sm:$0xff]  ;;  %v335_v7 = vld [vmem:[%s1870_s5 + $0x20] sm:$0xff]  ;;  %v338_v22 = vld [vmem:[%s1870_s5 + $0x38] sm:$0xff] }
  0x26   : > { %v1026_v6 = vpack.c.bf16 %v336_v4, %v332_v3  ;;  %v340_v8 = vld [vmem:[%s1870_s5 + $0x48] sm:$0xff]  ;;  %v1028_v10 = vpack.c.bf16 %v335_v7, %v331_v5  ;;  %v339_v12 = vld [vmem:[%s1870_s5 + $0x40] sm:$0xff]  ;;  %v1090_v24 = vpack.c.bf16 %v338_v22, %v334_v21  ;;  %v333_v25 = vld [vmem:[%s1870_s5 + $0x10] sm:$0xff] }
  0x27   : > { %v344_v9 = vld [vmem:[%s1870_s5 + $0x68] sm:$0xff]  ;;  %v343_v13 = vld [vmem:[%s1870_s5 + $0x60] sm:$0xff]  ;;  %v337_v26 = vld [vmem:[%s1870_s5 + $0x30] sm:$0xff] }
  0x28   : > { %v1030_v11 = vpack.c.bf16 %v344_v9, %v340_v8  ;;  %v348_v14 = vld [vmem:[%s1870_s5 + $0x88] sm:$0xff]  ;;  %1027 = vmatprep.subr.bf16.mxu0 %v1026_v6  ;;  %v1032_v16 = vpack.c.bf16 %v343_v13, %v339_v12  ;;  %v347_v17 = vld [vmem:[%s1870_s5 + $0x80] sm:$0xff]  ;;  %v1092_v27 = vpack.c.bf16 %v337_v26, %v333_v25  ;;  %1091 = vmatprep.subr.bf16.mxu1 %v1090_v24  ;;  %v342_v29 = vld [vmem:[%s1870_s5 + $0x58] sm:$0xff] }
  0x29   : > { %v352_v15 = vld [vmem:[%s1870_s5 + $0xa8] sm:$0xff]  ;;  %1029 = vmatpush1.bf16.msra.mxu0 %v1028_v10  ;;  %v351_v18 = vld [vmem:[%s1870_s5 + $0xa0] sm:$0xff]  ;;  %v346_v30 = vld [vmem:[%s1870_s5 + $0x78] sm:$0xff] }
  0x2a   : > { %1031 = vmatprep.subr.bf16.mxu0 %v1030_v11  ;;  %v1034_v19 = vpack.c.bf16 %v352_v15, %v348_v14  ;;  %v356_v20 = vld [vmem:[%s1870_s5 + $0xc8] sm:$0xff]  ;;  %v1036_v28 = vpack.c.bf16 %v351_v18, %v347_v17  ;;  %v341_v31 = vld [vmem:[%s1870_s5 + $0x50] sm:$0xff]  ;;  %v355_v33 = vld [vmem:[%s1870_s5 + $0xc0] sm:$0xff]  ;;  %1093 = vmatpush1.bf16.msra.mxu1 %v1092_v27  ;;  %v1094_v35 = vpack.c.bf16 %v346_v30, %v342_v29  ;;  %p318_p10 = scmp.gt.s32.totalorder %s1559_s27, 0 }
  0x2b   : > { %v360_v23 = vld [vmem:[%s1870_s5 + $0xe8] sm:$0xff]  ;;  %v359_v34 = vld [vmem:[%s1870_s5 + $0xe0] sm:$0xff]  ;;  %v345_v36 = vld [vmem:[%s1870_s5 + $0x70] sm:$0xff] }
  0x2c   : > { %v1038_v32 = vpack.c.bf16 %v360_v23, %v356_v20  ;;  %v364_v37 = vld [vmem:[%s1870_s5 + $0x108] sm:$0xff]  ;;  %v1096_v39 = vpack.c.bf16 %v345_v36, %v341_v31  ;;  %v350_v40 = vld [vmem:[%s1870_s5 + $0x98] sm:$0xff]  ;;  %1095 = vmatprep.subr.bf16.mxu1 %v1094_v35  ;;  %v349_v42 = vld [vmem:[%s1870_s5 + $0x90] sm:$0xff]  ;;  %v1040_v44 = vpack.c.bf16 %v359_v34, %v355_v33  ;;  %s1636_s20 = scalar_select %p318_p10, 1, 0 }
  0x2d   : > { %1033 = vmatpush1.bf16.msra.mxu0 %v1032_v16  ;;  %v368_v38 = vld [vmem:[%s1870_s5 + $0x128] sm:$0xff]  ;;  %v354_v41 = vld [vmem:[%s1870_s5 + $0xb8] sm:$0xff]  ;;  %v353_v43 = vld [vmem:[%s1870_s5 + $0xb0] sm:$0xff] }
  0x2e   : > { %1035 = vmatprep.subr.bf16.mxu0 %v1034_v19  ;;  %v363_v45 = vld [vmem:[%s1870_s5 + $0x100] sm:$0xff]  ;;  %v1098_v47 = vpack.c.bf16 %v354_v41, %v350_v40  ;;  %v1042_v48 = vpack.c.bf16 %v368_v38, %v364_v37  ;;  %1097 = vmatpush1.bf16.msra.mxu1 %v1096_v39  ;;  %v372_v49 = vld [vmem:[%s1870_s5 + $0x148] sm:$0xff]  ;;  %v1100_v50 = vpack.c.bf16 %v353_v43, %v349_v42  ;;  %v358_v51 = vld [vmem:[%s1870_s5 + $0xd8] sm:$0xff]  ;;  %s320_s17 = scvt.s32.f32 %s1636_s20 }
  0x2f   : > { %v367_v46 = vld [vmem:[%s1870_s5 + $0x120] sm:$0xff]  ;;  %v362_v52 = vld [vmem:[%s1870_s5 + $0xf8] sm:$0xff]  ;;  %v376_v53 = vld [vmem:[%s1870_s5 + $0x168] sm:$0xff] }
  0x30   : > { %1099 = vmatprep.subr.bf16.mxu1 %v1098_v47  ;;  %v1102_v54 = vpack.c.bf16 %v362_v52, %v358_v51  ;;  %v357_v55 = vld [vmem:[%s1870_s5 + $0xd0] sm:$0xff]  ;;  %v1044_v57 = vpack.c.bf16 %v367_v46, %v363_v45  ;;  %v366_v58 = vld [vmem:[%s1870_s5 + $0x118] sm:$0xff]  ;;  %v1046_v60 = vpack.c.bf16 %v376_v53, %v372_v49  ;;  %v371_v61 = vld [vmem:[%s1870_s5 + $0x140] sm:$0xff]  ;;  %s1689_s16 = ssub.f32 1.0, %s320_s17 }
  0x31   : > { %1037 = vmatpush1.bf16.msra.mxu0 %v1036_v28  ;;  %v361_v56 = vld [vmem:[%s1870_s5 + $0xf0] sm:$0xff]  ;;  %v370_v59 = vld [vmem:[%s1870_s5 + $0x138] sm:$0xff]  ;;  %v375_v62 = vld [vmem:[%s1870_s5 + $0x160] sm:$0xff] }
  0x32   : > { %1039 = vmatprep.subr.bf16.mxu0 %v1038_v32  ;;  %1101 = vmatpush1.bf16.msra.mxu1 %v1100_v50  ;;  %v380_v63 = vld [vmem:[%s1870_s5 + $0x188] sm:$0xff]  ;;  %v1104_v0 = vpack.c.bf16 %v361_v56, %v357_v55  ;;  %v1106_v2 = vpack.c.bf16 %v370_v59, %v366_v58  ;;  %v365_v3 = vld [vmem:[%s1870_s5 + $0x110] sm:$0xff]  ;;  %v374_v5 = vld [vmem:[%s1870_s5 + $0x158] sm:$0xff]  ;;  %v1048_v7 = vpack.c.bf16 %v375_v62, %v371_v61 }
  0x33   : > { %v384_v1 = vld [vmem:[%s1870_s5 + $0x1a8] sm:$0xff]  ;;  %1103 = vmatprep.subr.bf16.mxu1 %v1102_v54  ;;  %v369_v4 = vld [vmem:[%s1870_s5 + $0x130] sm:$0xff]  ;;  %v378_v6 = vld [vmem:[%s1870_s5 + $0x178] sm:$0xff] }
  0x34   : > { %v1050_v8 = vpack.c.bf16 %v384_v1, %v380_v63  ;;  %v379_v9 = vld [vmem:[%s1870_s5 + $0x180] sm:$0xff]  ;;  %v388_v11 = vld [vmem:[%s1870_s5 + $0x1c8] sm:$0xff]  ;;  %v1108_v12 = vpack.c.bf16 %v369_v4, %v365_v3  ;;  %v1110_v14 = vpack.c.bf16 %v378_v6, %v374_v5  ;;  %v373_v15 = vld [vmem:[%s1870_s5 + $0x150] sm:$0xff] }
  0x35   : > { %1041 = vmatpush1.bf16.msra.mxu0 %v1040_v44  ;;  %v383_v10 = vld [vmem:[%s1870_s5 + $0x1a0] sm:$0xff]  ;;  %v392_v13 = vld [vmem:[%s1870_s5 + $0x1e8] sm:$0xff]  ;;  %v377_v16 = vld [vmem:[%s1870_s5 + $0x170] sm:$0xff] }
  0x36   : > { %1043 = vmatprep.subr.bf16.mxu0 %v1042_v48  ;;  %1105 = vmatpush1.bf16.msra.mxu1 %v1104_v0  ;;  %v382_v17 = vld [vmem:[%s1870_s5 + $0x198] sm:$0xff]  ;;  %v1052_v19 = vpack.c.bf16 %v383_v10, %v379_v9  ;;  %v1054_v20 = vpack.c.bf16 %v392_v13, %v388_v11  ;;  %v387_v21 = vld [vmem:[%s1870_s5 + $0x1c0] sm:$0xff]  ;;  %v396_v23 = vld [vmem:[%s1870_s5 + $0x208] sm:$0xff]  ;;  %v1112_v24 = vpack.c.bf16 %v377_v16, %v373_v15 }
  0x37   : > { %1107 = vmatprep.subr.bf16.mxu1 %v1106_v2  ;;  %v386_v18 = vld [vmem:[%s1870_s5 + $0x1b8] sm:$0xff]  ;;  %v391_v22 = vld [vmem:[%s1870_s5 + $0x1e0] sm:$0xff]  ;;  %v400_v25 = vld [vmem:[%s1870_s5 + $0x228] sm:$0xff] }
  0x38   : > { %v1114_v26 = vpack.c.bf16 %v386_v18, %v382_v17  ;;  %v381_v27 = vld [vmem:[%s1870_s5 + $0x190] sm:$0xff]  ;;  %v390_v29 = vld [vmem:[%s1870_s5 + $0x1d8] sm:$0xff]  ;;  %v1056_v31 = vpack.c.bf16 %v391_v22, %v387_v21  ;;  %v1058_v32 = vpack.c.bf16 %v400_v25, %v396_v23  ;;  %v395_v33 = vld [vmem:[%s1870_s5 + $0x200] sm:$0xff] }
  0x39   : > { %1045 = vmatpush1.bf16.msra.mxu0 %v1044_v57  ;;  %v385_v28 = vld [vmem:[%s1870_s5 + $0x1b0] sm:$0xff]  ;;  %v394_v30 = vld [vmem:[%s1870_s5 + $0x1f8] sm:$0xff]  ;;  %v399_v34 = vld [vmem:[%s1870_s5 + $0x220] sm:$0xff] }
  0x3a   : > { %1047 = vmatprep.subr.bf16.mxu0 %v1046_v60  ;;  %1109 = vmatpush1.bf16.msra.mxu1 %v1108_v12  ;;  %v404_v35 = vld [vmem:[%s1870_s5 + $0x248] sm:$0xff]  ;;  %v1116_v36 = vpack.c.bf16 %v385_v28, %v381_v27  ;;  %v1118_v38 = vpack.c.bf16 %v394_v30, %v390_v29  ;;  %v389_v39 = vld [vmem:[%s1870_s5 + $0x1d0] sm:$0xff]  ;;  %v398_v41 = vld [vmem:[%s1870_s5 + $0x218] sm:$0xff]  ;;  %v1060_v43 = vpack.c.bf16 %v399_v34, %v395_v33 }
  0x3b   : > { %1111 = vmatprep.subr.bf16.mxu1 %v1110_v14  ;;  %v408_v37 = vld [vmem:[%s1870_s5 + $0x268] sm:$0xff]  ;;  %v393_v40 = vld [vmem:[%s1870_s5 + $0x1f0] sm:$0xff]  ;;  %v402_v42 = vld [vmem:[%s1870_s5 + $0x238] sm:$0xff] }
  0x3c   : > { %v1062_v44 = vpack.c.bf16 %v408_v37, %v404_v35  ;;  %v403_v45 = vld [vmem:[%s1870_s5 + $0x240] sm:$0xff]  ;;  %v412_v47 = vld [vmem:[%s1870_s5 + $0x288] sm:$0xff]  ;;  %v1120_v48 = vpack.c.bf16 %v393_v40, %v389_v39  ;;  %v1122_v50 = vpack.c.bf16 %v402_v42, %v398_v41  ;;  %v397_v51 = vld [vmem:[%s1870_s5 + $0x210] sm:$0xff] }
  0x3d   : > { %1049 = vmatpush1.bf16.msra.mxu0 %v1048_v7  ;;  %v407_v46 = vld [vmem:[%s1870_s5 + $0x260] sm:$0xff]  ;;  %v416_v49 = vld [vmem:[%s1870_s5 + $0x2a8] sm:$0xff]  ;;  %v401_v52 = vld [vmem:[%s1870_s5 + $0x230] sm:$0xff] }
  0x3e   : > { %1051 = vmatprep.subr.bf16.mxu0 %v1050_v8  ;;  %1113 = vmatpush1.bf16.msra.mxu1 %v1112_v24  ;;  %v406_v53 = vld [vmem:[%s1870_s5 + $0x258] sm:$0xff]  ;;  %v1064_v55 = vpack.c.bf16 %v407_v46, %v403_v45  ;;  %v411_v56 = vld [vmem:[%s1870_s5 + $0x280] sm:$0xff]  ;;  %v1066_v57 = vpack.c.bf16 %v416_v49, %v412_v47  ;;  %v420_v59 = vld [vmem:[%s1870_s5 + $0x2c8] sm:$0xff]  ;;  %v1124_v61 = vpack.c.bf16 %v401_v52, %v397_v51 }
  0x3f   : > { %1115 = vmatprep.subr.bf16.mxu1 %v1114_v26  ;;  %v410_v54 = vld [vmem:[%s1870_s5 + $0x278] sm:$0xff]  ;;  %v415_v58 = vld [vmem:[%s1870_s5 + $0x2a0] sm:$0xff]  ;;  %v424_v60 = vld [vmem:[%s1870_s5 + $0x2e8] sm:$0xff] }
  0x40   : > { %v1126_v62 = vpack.c.bf16 %v410_v54, %v406_v53  ;;  %v405_v63 = vld [vmem:[%s1870_s5 + $0x250] sm:$0xff]  ;;  %v329_v1 = vld [vmem:[#allocation2] sm:$0xff]  ;;  %v414_v2 = vld [vmem:[%s1870_s5 + $0x298] sm:$0xff]  ;;  %v1068_v4 = vpack.c.bf16 %v415_v58, %v411_v56  ;;  %v1070_v5 = vpack.c.bf16 %v424_v60, %v420_v59  ;;  %v322_v54 = vstv %s320_s17 }
  0x41   : > { %1053 = vmatpush1.bf16.msra.mxu0 %v1052_v19  ;;  %v409_v0 = vld [vmem:[%s1870_s5 + $0x270] sm:$0xff]  ;;  %v418_v3 = vld [vmem:[%s1870_s5 + $0x2b8] sm:$0xff]  ;;  %545 = vmatprep.mubr.f32.mxu0 %v329_v1  ;;  %v419_v6 = vld [vmem:[%s1870_s5 + $0x2c0] sm:$0xff]  ;;  %v326_v56 = vstv %s1689_s16 }
  0x42   : > { %1055 = vmatprep.subr.bf16.mxu0 %v1054_v20  ;;  %1117 = vmatpush1.bf16.msra.mxu1 %v1116_v36  ;;  %v423_v7 = vld [vmem:[%s1870_s5 + $0x2e0] sm:$0xff]  ;;  %v428_v8 = vld [vmem:[%s1870_s5 + $0x308] sm:$0xff]  ;;  %v1128_v9 = vpack.c.bf16 %v409_v0, %v405_v63  ;;  %v1130_v11 = vpack.c.bf16 %v418_v3, %v414_v2  ;;  %v413_v12 = vld [vmem:[%s1870_s5 + $0x290] sm:$0xff] }
  0x43   : > { %1119 = vmatprep.subr.bf16.mxu1 %v1118_v38  ;;  %616 = vmatprep.mubr.f32.mxu1 %v329_v1  ;;  %v432_v10 = vld [vmem:[%s1870_s5 + $0x328] sm:$0xff]  ;;  %v417_v13 = vld [vmem:[%s1870_s5 + $0x2b0] sm:$0xff]  ;;  %v422_v14 = vld [vmem:[%s1870_s5 + $0x2d8] sm:$0xff]  ;;  %v1072_v16 = vpack.c.bf16 %v423_v7, %v419_v6 }
  0x44   : > { %v426_v15 = vld [vmem:[%s1870_s5 + $0x2f8] sm:$0xff]  ;;  %v1074_v17 = vpack.c.bf16 %v432_v10, %v428_v8  ;;  %v427_v18 = vld [vmem:[%s1870_s5 + $0x300] sm:$0xff]  ;;  %v436_v20 = vld [vmem:[%s1870_s5 + $0x348] sm:$0xff]  ;;  %v1132_v21 = vpack.c.bf16 %v417_v13, %v413_v12 }
  0x45   : > { %1057 = vmatpush1.bf16.msra.mxu0 %v1056_v31  ;;  %v431_v19 = vld [vmem:[%s1870_s5 + $0x320] sm:$0xff]  ;;  %v440_v22 = vld [vmem:[%s1870_s5 + $0x368] sm:$0xff]  ;;  %v1134_v23 = vpack.c.bf16 %v426_v15, %v422_v14  ;;  %v421_v24 = vld [vmem:[%s1870_s5 + $0x2d0] sm:$0xff]  ;;  %v1256_v14 = vmov 0.0|0.0  }
  0x46   : > { %1059 = vmatprep.subr.bf16.mxu0 %v1058_v32  ;;  %1121 = vmatpush1.bf16.msra.mxu1 %v1120_v48  ;;  %v425_v25 = vld [vmem:[%s1870_s5 + $0x2f0] sm:$0xff]  ;;  %v430_v26 = vld [vmem:[%s1870_s5 + $0x318] sm:$0xff]  ;;  %v1076_v28 = vpack.c.bf16 %v431_v19, %v427_v18  ;;  %v1078_v29 = vpack.c.bf16 %v440_v22, %v436_v20  ;;  %v435_v30 = vld [vmem:[%s1870_s5 + $0x340] sm:$0xff] }
  0x47   : > { %1123 = vmatprep.subr.bf16.mxu1 %v1122_v50  ;;  %v434_v27 = vld [vmem:[%s1870_s5 + $0x338] sm:$0xff]  ;;  %v439_v31 = vld [vmem:[%s1870_s5 + $0x360] sm:$0xff]  ;;  %v444_v32 = vld [vmem:[%s1870_s5 + $0x388] sm:$0xff]  ;;  %v1136_v33 = vpack.c.bf16 %v425_v25, %v421_v24 }
  0x48   : > { %v448_v34 = vld [vmem:[%s1870_s5 + $0x3a8] sm:$0xff]  ;;  %v1138_v35 = vpack.c.bf16 %v434_v27, %v430_v26  ;;  %v429_v36 = vld [vmem:[%s1870_s5 + $0x310] sm:$0xff]  ;;  %v438_v38 = vld [vmem:[%s1870_s5 + $0x358] sm:$0xff]  ;;  %v1080_v40 = vpack.c.bf16 %v439_v31, %v435_v30 }
  0x49   : > { %1061 = vmatpush1.bf16.msra.mxu0 %v1060_v43  ;;  %v433_v37 = vld [vmem:[%s1870_s5 + $0x330] sm:$0xff]  ;;  %v442_v39 = vld [vmem:[%s1870_s5 + $0x378] sm:$0xff]  ;;  %v1082_v41 = vpack.c.bf16 %v448_v34, %v444_v32  ;;  %v443_v42 = vld [vmem:[%s1870_s5 + $0x380] sm:$0xff]  ;;  %v1258_v32 = vmov 0.0  }
  0x4a   : > { %1063 = vmatprep.subr.bf16.mxu0 %v1062_v44  ;;  %1125 = vmatpush1.bf16.msra.mxu1 %v1124_v61  ;;  %v447_v43 = vld [vmem:[%s1870_s5 + $0x3a0] sm:$0xff]  ;;  %v452_v44 = vld [vmem:[%s1870_s5 + $0x3c8] sm:$0xff]  ;;  %v1140_v45 = vpack.c.bf16 %v433_v37, %v429_v36  ;;  %v1142_v47 = vpack.c.bf16 %v442_v39, %v438_v38  ;;  %v437_v48 = vld [vmem:[%s1870_s5 + $0x350] sm:$0xff]  ;;  %v461_v37 = vlaneseq }
  0x4b   : > { %1127 = vmatprep.subr.bf16.mxu1 %v1126_v62  ;;  %v456_v46 = vld [vmem:[%s1870_s5 + $0x3e8] sm:$0xff]  ;;  %v441_v49 = vld [vmem:[%s1870_s5 + $0x370] sm:$0xff]  ;;  %v446_v50 = vld [vmem:[%s1870_s5 + $0x398] sm:$0xff]  ;;  %v1084_v52 = vpack.c.bf16 %v447_v43, %v443_v42 }
  0x4c   : > { %v450_v51 = vld [vmem:[%s1870_s5 + $0x3b8] sm:$0xff]  ;;  %v321_v53 = vld [vmem:[%s1328_s19] sm:$0xff]  ;;  %v1144_v60 = vpack.c.bf16 %v441_v49, %v437_v48  ;;  %v445_v62 = vld [vmem:[%s1870_s5 + $0x390] sm:$0xff]  ;;  %v462_v38 = vshrl.u32 %v461_v37, 7 }
  0x4d   : > { %1065 = vmatpush1.bf16.msra.mxu0 %v1064_v55  ;;  %v324_v55 = vld [vmem:[#allocation4] sm:$0xff]  ;;  %v451_v58 = vld [vmem:[%s1870_s5 + $0x3c0] sm:$0xff]  ;;  %v1146_v61 = vpack.c.bf16 %v450_v51, %v446_v50  ;;  %v323_v0 = vmul.f32 %v322_v54, %v321_v53  ;;  %v454_v2 = vld [vmem:[%s1870_s5 + $0x3d8] sm:$0xff] }
  0x4e   : > { %1067 = vmatprep.subr.bf16.mxu0 %v1066_v57  ;;  %1129 = vmatpush1.bf16.msra.mxu1 %v1128_v9  ;;  %v1086_v57 = vpack.c.bf16 %v456_v46, %v452_v44  ;;  %v455_v59 = vld [vmem:[%s1870_s5 + $0x3e0] sm:$0xff]  ;;  %v449_v63 = vld [vmem:[%s1870_s5 + $0x3b0] sm:$0xff]  ;;  %v327_v1 = vmul.f32 %v326_v56, %v324_v55  ;;  %v458_v3 = vld [vmem:[%s1870_s5 + $0x3f8] sm:$0xff]  ;;  %v463_v39 = vsub.s32 0, %v462_v38  ;;  %v475_v44 = vsub.s32 3, %v462_v38 }
  0x4f   : > { %1131 = vmatprep.subr.bf16.mxu1 %v1130_v11  ;;  %v1150_v6 = vpack.c.bf16 %v458_v3, %v454_v2  ;;  %v453_v7 = vld [vmem:[%s1870_s5 + $0x3d0] sm:$0xff]  ;;  %v647_v11 = vld [vmem:[%s1872_s7] sm:$0xff]  ;;  %v648_v12 = vld [vmem:[%s1872_s7 + $0x8] sm:$0xff] }
  0x50   : > { %v457_v8 = vld [vmem:[%s1870_s5 + $0x3f0] sm:$0xff]  ;;  %v328_v9 = vadd.f32 %v327_v1, %v323_v0  ;;  %v1155_v13 = vpack.c.bf16 %v648_v12, %v647_v11  ;;  %v651_v18 = vld [vmem:[%s1872_s7 + $0x20] sm:$0xff]  ;;  %v652_v19 = vld [vmem:[%s1872_s7 + $0x28] sm:$0xff] }
  0x51   : > { %1069 = vmatpush1.bf16.msra.mxu0 %v1068_v4  ;;  %v1088_v4 = vpack.c.bf16 %v455_v59, %v451_v58  ;;  %v1152_v10 = vpack.c.bf16 %v457_v8, %v453_v7  ;;  %v649_v15 = vld [vmem:[%s1872_s7 + $0x10] sm:$0xff]  ;;  %v1161_v20 = vpack.c.bf16 %v652_v19, %v651_v18  ;;  %v654_v22 = vld [vmem:[%s1872_s7 + $0x38] sm:$0xff]  ;;  %v655_v24 = vld [vmem:[%s1872_s7 + $0x40] sm:$0xff] }
  0x52   : > { %1071 = vmatprep.subr.bf16.mxu0 %v1070_v5  ;;  %1133 = vmatpush1.bf16.msra.mxu1 %v1132_v21  ;;  %v1148_v5 = vpack.c.bf16 %v449_v63, %v445_v62  ;;  %v653_v21 = vld [vmem:[%s1872_s7 + $0x30] sm:$0xff]  ;;  %v656_v25 = vld [vmem:[%s1872_s7 + $0x48] sm:$0xff]  ;;  %v659_v30 = vld [vmem:[%s1872_s7 + $0x60] sm:$0xff] }
  0x53   : > { %1135 = vmatprep.subr.bf16.mxu1 %v1134_v23  ;;  %v1164_v23 = vpack.c.bf16 %v654_v22, %v653_v21  ;;  %v1167_v26 = vpack.c.bf16 %v656_v25, %v655_v24  ;;  %v657_v27 = vld [vmem:[%s1872_s7 + $0x50] sm:$0xff]  ;;  %v660_v31 = vld [vmem:[%s1872_s7 + $0x68] sm:$0xff]  ;;  %v917_v11 = vld [vmem:[%s1873_s8] ss:$0 sm:$0xff] }
  0x54   : > { %v661_v34 = vld [vmem:[%s1872_s7 + $0x70] sm:$0xff]  ;;  %v330_v1 = vld [vmem:[#allocation3] sm:$0xff]  ;;  %v766_v21 = vld [vmem:[%s1869_s4] sm:$0xff] }
  0x55   : > { %1073 = vmatpush1.bf16.msra.mxu0 %v1072_v16  ;;  %v650_v16 = vld [vmem:[%s1872_s7 + $0x18] sm:$0xff]  ;;  %v767_v22 = vld [vmem:[%s1869_s4 + $0x8] sm:$0xff] }
  0x56   : > { %1075 = vmatprep.subr.bf16.mxu0 %v1074_v17  ;;  %1137 = vmatpush1.bf16.msra.mxu1 %v1136_v33  ;;  %v1158_v17 = vpack.c.bf16 %v650_v16, %v649_v15  ;;  %v1173_v33 = vpack.c.bf16 %v660_v31, %v659_v30  ;;  %v744_v16 = vand.u32 127, %v461_v37  ;;  %v1179_v24 = vpack.c.bf16 %v767_v22, %v766_v21  ;;  %v769_v25 = vld [vmem:[%s1869_s4 + $0x18] sm:$0xff]  ;;  %v772_v30 = vld [vmem:[%s1869_s4 + $0x30] sm:$0xff] }
  0x57   : > { %1139 = vmatprep.subr.bf16.mxu1 %v1138_v35  ;;  %v662_v35 = vld [vmem:[%s1872_s7 + $0x78] sm:$0xff] }
  0x58   : > { %v1176_v36 = vpack.c.bf16 %v662_v35, %v661_v34  ;;  %v773_v31 = vld [vmem:[%s1869_s4 + $0x38] sm:$0xff]  ;;  %v775_v34 = vld [vmem:[%s1869_s4 + $0x48] sm:$0xff] }
  0x59   : > { %1077 = vmatpush1.bf16.msra.mxu0 %v1076_v28  ;;  %v658_v28 = vld [vmem:[%s1872_s7 + $0x58] sm:$0xff] }
  0x5a   : > { %1079 = vmatprep.subr.bf16.mxu0 %v1078_v29  ;;  %1141 = vmatpush1.bf16.msra.mxu1 %v1140_v45  ;;  %v1170_v29 = vpack.c.bf16 %v658_v28, %v657_v27  ;;  %v770_v27 = vld [vmem:[%s1869_s4 + $0x20] sm:$0xff]  ;;  %v771_v28 = vld [vmem:[%s1869_s4 + $0x28] sm:$0xff]  ;;  %v777_v37 = vld [vmem:[%s1869_s4 + $0x58] sm:$0xff] }
  0x5b   : > { %1143 = vmatprep.subr.bf16.mxu1 %v1142_v47 }
  0x5d   : > { %1081 = vmatpush1.bf16.msra.mxu0 %v1080_v40  ;;  %v459_v40 = vld [vmem:[%s1871_s6] sm:$0xf] }
  0x5e   : > { %1083 = vmatprep.subr.bf16.mxu0 %v1082_v41  ;;  %1145 = vmatpush1.bf16.msra.mxu1 %v1144_v60  ;;  %v467_v41 = vsub.s32 1, %v462_v38  ;;  %v464_v42 = vrot.slane %v459_v40, %v463_v39  ;;  %v476_v50 = vrot.slane %v459_v40, %v475_v44  ;;  %v778_v39 = vld [vmem:[%s1869_s4 + $0x60] sm:$0xff] }
  0x5f   : > { %1147 = vmatprep.subr.bf16.mxu1 %v1146_v61 }
  0x60   : > { %v468_v43 = vrot.slane %v459_v40, %v467_v41 }
  0x61   : > { %1085 = vmatpush1.bf16.msra.mxu0 %v1084_v52  ;;  %v471_v52 = vsub.s32 2, %v462_v38 }
  0x62   : > { %1087 = vmatprep.subr.bf16.mxu0 %v1086_v57  ;;  %1149 = vmatpush1.bf16.msra.mxu1 %v1148_v5 }
  0x63   : > { %1151 = vmatprep.subr.bf16.mxu1 %v1150_v6  ;;  %v472_v56 = vrot.slane %v459_v40, %v471_v52  ;;  %v779_v40 = vld [vmem:[%s1869_s4 + $0x68] sm:$0xff] }
  0x64   : > { %v1197_v41 = vpack.c.bf16 %v779_v40, %v778_v39 }
  0x65   : > { %1089 = vmatpush1.bf16.msra.mxu0 %v1088_v4 }
  0x66   : > { %1153 = vmatpush1.bf16.msra.mxu1 %v1152_v10  ;;  %1154 = vmatprep.subr.bf16.mxu0 %v1256_v14 }
  0x67   : > { %1178 = vmatprep.subr.bf16.mxu1 %v1256_v14 }
  0x68   : > { %546 = vmatmul.mubr.f32.vlgmr.msra.gmra.mrb[0].mxu0 %v328_v9 }
  0x69   : > { %617 = vmatmul.mubr.f32.vlgmr.msra.gmra.mrb[0].mxu1 %v328_v9  ;;  %1156 = vmatpush3.bf16.msra.mxu0 %v1155_v13 }
  0x6a   : > { %1157 = vmatprep.subr.bf16.mxu0 %v1256_v14  ;;  %988 = vmatprep.mubr.msk.f32.mxu0 %vm1257_vm0, %v1258_v32 }
  0x6b   : > { %1023 = vmatprep.mubr.msk.f32.mxu1 %vm1257_vm0, %v1258_v32  ;;  %1180 = vmatpush3.bf16.msra.mxu1 %v1179_v24  ;;  %v1188_v32 = vpack.c.bf16 %v773_v31, %v772_v30 }
  0x6c   : > { %1181 = vmatprep.subr.bf16.mxu1 %v1256_v14 }
  0x6d   : > { %1159 = vmatpush3.bf16.msra.mxu0 %v1158_v17 }
  0x6e   : > { %1160 = vmatprep.subr.bf16.mxu0 %v1256_v14 }
  0x71   : > { %1162 = vmatpush3.bf16.msra.mxu0 %v1161_v20 }
  0x72   : > { %1163 = vmatprep.subr.bf16.mxu0 %v1256_v14 }
  0x75   : > { %1165 = vmatpush3.bf16.msra.mxu0 %v1164_v23  ;;  %v768_v23 = vld [vmem:[%s1869_s4 + $0x10] sm:$0xff] }
  0x76   : > { %1166 = vmatprep.subr.bf16.mxu0 %v1256_v14 }
  0x79   : > { %1168 = vmatpush3.bf16.msra.mxu0 %v1167_v26  ;;  %v1182_v26 = vpack.c.bf16 %v769_v25, %v768_v23 }
  0x7a   : > { %1169 = vmatprep.subr.bf16.mxu0 %v1256_v14 }
  0x7b   : > { %1183 = vmatpush3.bf16.msra.mxu1 %v1182_v26 }
  0x7c   : > { %1184 = vmatprep.subr.bf16.mxu1 %v1256_v14 }
  0x7d   : > { %1171 = vmatpush3.bf16.msra.mxu0 %v1170_v29  ;;  %v1185_v29 = vpack.c.bf16 %v771_v28, %v770_v27 }
  0x7e   : > { %1172 = vmatprep.subr.bf16.mxu0 %v1256_v14 }
  0x7f   : > { %1186 = vmatpush3.bf16.msra.mxu1 %v1185_v29 }
  0x80   : > { %1187 = vmatprep.subr.bf16.mxu1 %v1256_v14 }
  0x81   : > { %1174 = vmatpush3.bf16.msra.mxu0 %v1173_v33  ;;  %v774_v33 = vld [vmem:[%s1869_s4 + $0x40] sm:$0xff] }
  0x82   : > { %1175 = vmatprep.subr.bf16.mxu0 %v1256_v14  ;;  %v1191_v35 = vpack.c.bf16 %v775_v34, %v774_v33 }
  0x83   : > { %1189 = vmatpush3.bf16.msra.mxu1 %v1188_v32 }
  0x84   : > { %1190 = vmatprep.subr.bf16.mxu1 %v1256_v14 }
  0x85   : > { %1177 = vmatpush3.bf16.msra.mxu0 %v1176_v36  ;;  %v776_v36 = vld [vmem:[%s1869_s4 + $0x50] sm:$0xff] }
  0x86   : > { %v1194_v38 = vpack.c.bf16 %v777_v37, %v776_v36 }
  0x87   : > { %1192 = vmatpush3.bf16.msra.mxu1 %v1191_v35 }
  0x88   : > { %1193 = vmatprep.subr.bf16.mxu1 %v1256_v14 }
  0x8b   : > { %1195 = vmatpush3.bf16.msra.mxu1 %v1194_v38 }
  0x8c   : > { %1196 = vmatprep.subr.bf16.mxu1 %v1256_v14 }
  0x8f   : > { %1198 = vmatpush3.bf16.msra.mxu1 %v1197_v41 }
  0x90   : > { %1199 = vmatprep.subr.bf16.mxu1 %v1256_v14 }
 0x13b   : > { %v547_v45 = vpop.f32.mrb[0].mxu0 }
 0x13c   : > { %v548_v46 = vadd.f32 %v547_v45, %v464_v42  ;;  %v549_v47 = vpop.f32.mrb[1].mxu0  ;;  %v618_v53 = vpop.f32.mrb[0].mxu1 }
 0x13d   : > { %v550_v48 = vadd.f32 %v549_v47, %v468_v43  ;;  %v620_v54 = vpop.f32.mrb[1].mxu1  ;;  %v619_v58 = vadd.f32 %v618_v53, %v472_v56  ;;  %v781_v47 = vld [vmem:[%s1869_s4 + $0x78] sm:$0xff]  ;;  %v1259_v53 = vmov 1.0  }
 0x13e   : > { %v914_v49 = vmul.f32 -1.442695, %v548_v46  ;;  %v621_v55 = vadd.f32 %v620_v54, %v476_v50  ;;  %v780_v46 = vld [vmem:[%s1869_s4 + $0x70] sm:$0xff] }
 0x13f   : > { %v915_v51 = vmul.f32 -1.442695, %v550_v48  ;;  %v1200_v48 = vpack.c.bf16 %v781_v47, %v780_v46 }
 0x140   : > { %1216 = vpow2.f32 %v914_v49  ;;  %v916_v57 = vmul.f32 -1.442695, %v621_v55 }
 0x141   : > { %1218 = vpow2.f32 %v915_v51  ;;  %1201 = vmatpush3.bf16.msra.mxu1 %v1200_v48 }
 0x142   : > { %1220 = vpow2.f32 %v916_v57 }
 0x143   : > { %1222 = vtanh.f32 %v619_v58 }
 0x14a   : > { %v1217_v59 = vpop.eup %1216 }
 0x14b   : > { %v1219_v60 = vpop.eup %1218  ;;  %v626_v61 = vadd.f32 1.0, %v1217_v59 }
 0x14c   : > { %v632_v62 = vadd.f32 1.0, %v1219_v60  ;;  %v1221_v63 = vpop.eup %1220 }
 0x14d   : > { %1224 = vrcp.f32 %v626_v61  ;;  %v1223_v0 = vpop.eup %1222  ;;  %v639_v3 = vadd.f32 1.0, %v1221_v63 }
 0x14e   : > { %1226 = vrcp.f32 %v632_v62 }
 0x14f   : > { %1228 = vrcp.f32 %v639_v3 }
 0x157   : > { %v1225_v2 = vpop.eup %1224 }
 0x158   : > { %v1227_v4 = vpop.eup %1226  ;;  %v643_v5 = vmul.f32 %v1225_v2, %v1223_v0 }
 0x159   : > { %v642_v6 = vmul.f32 %v1227_v4, %v330_v1  ;;  %v1229_v8 = vpop.eup %1228 }
 0x15b   : > { %v644_v7 = vadd.f32 %v643_v5, %v642_v6 }
 0x15d   : > { %1230 = vtanh.f32 %v644_v7  ;;  %742 = vst [vmem:[#allocation3] sm:$0xff] %v644_v7 }
 0x167   : > { %v1231_v9 = vpop.eup %1230 }
 0x168   : > { %v646_v10 = vmul.f32 %v1231_v9, %v1229_v8 }
 0x16a   : > { %989 = vmatmul.mubr.f32.vlgmr.msra.gmra.mrb[2].mxu0 %v646_v10  ;;  %741 = vst [vmem:[#allocation2] sm:$0xff] %v646_v10 }
 0x23d   : > { %v736_v12 = vpop.f32.mrb[2].mxu0 }
 0x23e   : > { %v737_v13 = vadd.f32 %v917_v11, %v736_v12  ;;  %v990_v15 = vpop.f32.mrb[3].mxu0 }
 0x240   : > { %740 = vst [vmem:[%s1333_s22] sm:$0xff] %v737_v13  ;;  %745 = vmax.xlane.f32.xlu0 %v737_v13 }
 0x2cd   : > { %v746_v17 = vpop.xlane.xlu0 %745 }
 0x2ce   : > { %vm747_vm1 = vcmp.eq.f32.partialorder %v737_v13, %v746_v17 }
 0x2cf   : > { %v748_v18 = vsel %vm747_vm1, %v744_v16, 128 }
 0x2d0   : > { %v750_v19 = vshra.s32 %v748_v18, 16  ;;  %v749_v42 = vand.u32 65535, %v748_v18 }
 0x2d2   : > { %v752_v20 = vcvt.s32.f32 %v750_v19  ;;  %v751_v44 = vcvt.s32.f32 %v749_v42 }
 0x2d4   : > { %753 = vmin.xlane.f32.xlu0 %v752_v20 }
 0x361   : > { %v754_v43 = vpop.xlane.xlu0 %753 }
 0x362   : > { %vm755_vm2 = vcmp.eq.f32.partialorder %v752_v20, %v754_v43  ;;  %v760_v49 = vcvt.f32.s32 %v754_v43 }
 0x363   : > { %v756_v45 = vsel %vm755_vm2, %v751_v44, inf }
 0x364   : > { %757 = vmin.xlane.f32.xlu1 %v756_v45  ;;  %v761_v51 = vshll.u32 %v760_v49, 16 }
 0x3f1   : > { %v758_v50 = vpop.xlane.xlu1 %757 }
 0x3f2   : > { %v759_v14 = vcvt.f32.s32 %v758_v50 }
 0x3f4   : > { %v762_v52 = vadd.s32 %v761_v51, %v759_v14 }
 0x3f6   : > { %vm763_vm3 = vcmp.eq.s32.totalorder %v744_v16, %v762_v52 }
 0x3f7   : > { %1024 = vmatmul.mubr.msk.f32.vlgmr.msra.gmra.mrb[2].mxu1 %vm763_vm3, %v1259_v53 }
 0x4ca   : > { %v848_v54 = vpop.f32.mrb[2].mxu1 }
 0x4cb   : > { %852 = vst [vmem:[#allocation4] sm:$0xff] %v848_v54  ;;  %v1025_v55 = vpop.f32.mrb[3].mxu1 }
 0x4cc PF: > { %s25_s14 = sadd.s32 1, %s1252_s14  }
 0x4cd   : > { %p22_p11 = scmp.ge.s32.totalorder %s25_s14, 9  }
 0x4cf   :  { %24 = sbr.rel (!%p22_p11) target bundleno = 16 (0x10), region = 86 }

</bundles_post_ra>
